<compile_context>
chip_gen: v5e
topology: v5e:2x2
jax: 0.10.0
libtpu: 0.0.40
codegen_flags: <defaults>
</compile_context>

<pallas_src>
import jax
import jax.numpy as jnp
from jax.experimental import pallas as pl
from jax.experimental.pallas import tpu as pltpu

_SMALL_BYTES = 1 * 1024 * 1024          # below this, the Pallas copy never pays off
_LANE_CANDIDATES = (1024, 512, 256, 128)  # lane-dense last dims (multiples of 128)


def _tile_bytes():
    """Per-block byte budget, tuned per TPU generation (safe fallback: 2 MiB)."""
    try:
        kind = jax.devices()[0].device_kind.lower()
    except Exception:
        return 2 * 1024 * 1024
    if "v7" in kind:
        return 6 * 1024 * 1024   # v7x: ~3.2 TB/s per TC, 32 MiB scoped default
    if "v6" in kind:
        return 4 * 1024 * 1024   # v6e: >=512-row tiles already ~85% of roofline
    return 2 * 1024 * 1024       # v5e & others: stay under 16 MiB scoped default


def _identity_copy_kernel(x_ref, o_ref):
    # Identity copy of one lane-dense tile through VMEM.
    o_ref[...] = x_ref[...]


def _pallas_identity_copy_2d(x2d, block_rows, *, donate):
    rows, cols = x2d.shape
    itemsize = jnp.dtype(x2d.dtype).itemsize
    grid = (pl.cdiv(rows, block_rows),)
    return pl.pallas_call(
        _identity_copy_kernel,
        out_shape=jax.ShapeDtypeStruct((rows, cols), x2d.dtype),
        grid=grid,
        in_specs=[pl.BlockSpec((block_rows, cols), lambda i: (i, 0))],
        out_specs=pl.BlockSpec((block_rows, cols), lambda i: (i, 0)),
        # Only alias when the caller donated the buffer; otherwise XLA inserts
        # a hidden defensive copy of the still-live input.
        input_output_aliases=({0: 0} if donate else {}),
        cost_estimate=pl.CostEstimate(
            flops=0, transcendentals=0,
            bytes_accessed=2 * rows * cols * itemsize),
        compiler_params=pltpu.CompilerParams(
            dimension_semantics=("parallel",)),
    )(x2d)


def squeeze_extractor(x, *, use_pallas=True, donate=False):
    """Equivalent of SqueezeExtractor.forward: x.squeeze().unsqueeze(1)."""
    # --- shape bookkeeping (metadata only, element order unchanged) ---
    squeezed_shape = tuple(d for d in x.shape if d != 1)
    if len(squeezed_shape) == 0:
        # torch would error on unsqueeze(1) of a 0-d tensor; mirror that.
        raise ValueError("unsqueeze(1) on a 0-d tensor is out of range")
    out_shape = squeezed_shape[:1] + (1,) + squeezed_shape[1:]

    n = x.size
    itemsize = jnp.dtype(x.dtype).itemsize

    # Fast path: pure view change; XLA compiles this to a no-op / bitcast.
    #   - explicit opt-out,
    #   - empty tensors,
    #   - small inputs (launch overhead > copy time),
    #   - numel not lane-divisible (pad+copy+slice would be ~3x the traffic).
    lane = next((c for c in _LANE_CANDIDATES if n % c == 0), None)
    if (not use_pallas) or n == 0 or (n * itemsize < _SMALL_BYTES) or lane is None:
        return jnp.reshape(x, out_shape)

    # --- lane-dense, tiled identity copy through the Pallas kernel ---
    rows = n // lane
    x2d = jnp.reshape(x, (rows, lane))            # metadata-only reshape

    # Keep rows per block a multiple of 32 so packed sub-32-bit dtypes
    # (bf16 needs 16, int8 needs 32) avoid masked sublane accesses.
    block_rows = max(32, (_tile_bytes() // (lane * itemsize)) // 32 * 32)
    if rows <= block_rows:
        # Single full-array block (full-dim escape from the (8,128) rule).
        block_rows = rows
    # Otherwise Pallas masks the ragged last block automatically.

    y2d = _pallas_identity_copy_2d(x2d, block_rows, donate=donate)
    return jnp.reshape(y2d, out_shape)


if __name__ == "__main__":
    key = jax.random.PRNGKey(0)

    # 1) Small NCHW-style input (8 KiB): takes the small-input reshape bypass.
    x = jax.random.normal(key, (2, 4, 16, 16), dtype=jnp.float32)
    y = jax.block_until_ready(squeeze_extractor(x))
    expected = jnp.expand_dims(x, 1)            # squeeze is a no-op here
    assert y.shape == (2, 1, 4, 16, 16), y.shape
    assert y.dtype == x.dtype
    assert bool(jnp.array_equal(y, expected))

    # 2) Input with an existing size-1 dim (exercises the squeeze path).
    x2 = jax.random.normal(jax.random.PRNGKey(1), (2, 1, 8, 16), dtype=jnp.float32)
    y2 = jax.block_until_ready(squeeze_extractor(x2))
    assert y2.shape == (2, 1, 8, 16), y2.shape
    assert bool(jnp.array_equal(y2, x2.reshape(2, 8, 16)[:, None, :, :]))

    # 3) Large bf16 input, numel divisible by 1024: multi-block "parallel"
    #    grid through the Pallas kernel (lane = 1024).
    x3 = jax.random.normal(jax.random.PRNGKey(2), (4, 768, 1024), dtype=jnp.bfloat16)
    y3 = jax.block_until_ready(squeeze_extractor(x3))
    assert y3.shape == (4, 1, 768, 1024), y3.shape
    assert bool(jnp.array_equal(y3, jnp.expand_dims(x3, 1)))

    # 4) numel divisible by 512 but not 1024, rows not a multiple of
    #    block_rows: exercises the smaller lane width and the ragged last
    #    block (Pallas masking), with no wrapper-side pad/slice.
    x4 = jax.random.normal(jax.random.PRNGKey(3), (3, 999, 512), dtype=jnp.bfloat16)
    y4 = jax.block_until_ready(squeeze_extractor(x4))
    assert y4.shape == (3, 1, 999, 512), y4.shape
    assert bool(jnp.array_equal(y4, jnp.expand_dims(x4, 1)))

    # 5) numel not divisible by 128: falls back to the metadata-only reshape
    #    (strictly cheaper than pad + copy + slice).
    x5 = jax.random.normal(jax.random.PRNGKey(4), (3, 700, 1023), dtype=jnp.bfloat16)
    y5 = jax.block_until_ready(squeeze_extractor(x5))
    assert y5.shape == (3, 1, 700, 1023), y5.shape
    assert bool(jnp.array_equal(y5, jnp.expand_dims(x5, 1)))

    print("KERNEL_OK")
</pallas_src>

<mosaic_0001>
module attributes {stable_mosaic.version = 11 : i64} {
  func.func @_identity_copy_kernel(%arg0: i32, %arg1: memref<1024x1024xbf16, #tpu.memory_space<vmem>>, %arg2: memref<1024x1024xbf16, #tpu.memory_space<vmem>>) attributes {dimension_semantics = [#tpu.dimension_semantics<parallel>], iteration_bounds = array<i64: 3>, scalar_prefetch = 0 : i64, scratch_operands = 0 : i64, tpu.core_type = #tpu.core_type<tc>, window_params = [{transform_indices = @transform_0, window_bounds = array<i64: 1024, 1024>}, {transform_indices = @transform_1, window_bounds = array<i64: 1024, 1024>}]} {
    %c0 = arith.constant 0 : index
    %c0_0 = arith.constant 0 : index
    %0 = vector.load %arg1[%c0, %c0_0] : memref<1024x1024xbf16, #tpu.memory_space<vmem>>, vector<1024x1024xbf16>
    %c0_1 = arith.constant 0 : index
    %c0_2 = arith.constant 0 : index
    %1 = vector.load %arg2[%c0_1, %c0_2] : memref<1024x1024xbf16, #tpu.memory_space<vmem>>, vector<1024x1024xbf16>
    tpu.vector_store %arg2[%c0_1, %c0_2], %0 {strides = array<i32>} : memref<1024x1024xbf16, #tpu.memory_space<vmem>>, vector<1024x1024xbf16>,
    return
  }
  func.func @transform_0(%arg0: i32) -> (i32, i32) {
    %c0_i32 = arith.constant 0 : i32
    %c0_i32_0 = arith.constant 0 : i32
    return %arg0, %c0_i32 : i32, i32
  }
  func.func @transform_1(%arg0: i32) -> (i32, i32) {
    %c0_i32 = arith.constant 0 : i32
    %c0_i32_0 = arith.constant 0 : i32
    return %arg0, %c0_i32 : i32, i32
  }
}

</mosaic_0001>

<bundles_post_ra>
// kernel: tpu_custom_call.1
= control target key start
LH: loop header
LB: loop body
LE: loop exit
PB: predicated region body
PF: predicated region fallthrough
CT: control target
= control target key end

     0   :  { %6 = vsyncpa [#allocation3], 0  ;;  %s2590_s0 = inlined_call_operand.hbm [shape: bf16[3072,1024], index: 0, kind: input, shape index: {}]   ;;  %s2591_s1 = inlined_call_operand.hbm [shape: bf16[3072,1024], index: 1, kind: output, shape index: {}]  }
   0x1   :  { %8 = vsyncpa [#allocation3 + $0x1], 0 }
   0x2   :  { %9 = vsyncpa [#allocation4], 0 }
   0x3   :  { %11 = vsyncpa [#allocation4 + $0x1], 0  ;;  %s1436_s6 = smov 0   ;;  %s1438_s7 = smov 0  }
   0x4   :  { %s1440_s8 = smov 0   ;;  %s1442_s9 = smov 0  }
   0x5 LB: > { %s1457_s10 = sadd.s32 4294967295, %s1420_s9   ;;  %s1254_s11 = sadd.s32 4294967294, %s1420_s9   ;;  %s1420_s9 = sphi %s1442_s9, %s2600_s9   ;;  %s1416_s8 = sphi %s1440_s8, %s2599_s8   ;;  %s1412_s7 = sphi %s1438_s7, %s2598_s7   ;;  %s1408_s6 = sphi %s1436_s6, %s2597_s6  }
   0x6   : > { %s1461_s12 = sadd.s32 1, %s1420_s9   ;;  %s24_s13 = sadd.s32 1, %s1416_s8 }
   0x7   : > { %s21_s14 = ssub.s32 %s1420_s9, %s1461_s12  ;;  %p31_p0 = scmp.ne.s32.totalorder %s1416_s8, %s1412_s7 }
   0x8   : > { %p22_p1 = scmp.eq.s32.totalorder %s21_s14, 0  ;;  %p32_p2 = scmp.eq.s32.totalorder %s1420_s9, 0 }
   0x9   : > { %p37_p3 = scmp.ne.s32.totalorder %s1412_s7, %s1408_s6  ;;  %p38_p4 = scmp.eq.s32.totalorder %s1457_s10, 0 }
   0xa   : > { %s1473_s15 = scalar_select %p22_p1, %s1416_s8, %s24_s13  }
   0xb   : > { %p1475_p5 = por %p32_p2, %p31_p0  ;;  %p1479_p6 = por %p38_p4, %p37_p3 }
   0xc   : > { %p61_p7 = scmp.eq.s32.totalorder %s1457_s10, 2  ;;  %p67_p8 = scmp.eq.s32.totalorder %s1254_s11, 2 }
   0xd   : > { %p1286_p9 = scmp.lt.s32.totalorder %s1420_s9, 3  ;;  %s87_s20 = sand.u32 1, %s1416_s8  }
   0xe   : > { %p1485_p10 = por %p61_p7, %p31_p0  ;;  %p1489_p11 = por %p67_p8, %p37_p3 }
   0xf   : > { %s1271_s21 = sshll.u32 %s1420_s9, 12  ;;  %s1257_s22 = sshll.u32 %s87_s20, 12 }
  0x10   : > { %s97_s25 = scalar_lea.hbm %s2590_s0, %s1271_s21  ;;  %s91_s27 = scalar_lea.vmem [#allocation2], %s1257_s22 }
  0x11   : > { %s98_s26 = sshll.u32 %s97_s25, 4  ;;  %s100_s28 = sshll.u32 %s91_s27, 4  ;;  %s99_s26 = int_to_ptr.hbm [resolvable:$true] %s98_s26  ;;  %s101_s28 = int_to_ptr.vmem [resolvable:$true] %s100_s28 }
  0x12   : > { %p1500_p12 = pnand %p1286_p9, %p1475_p5  ;;  %p1261_p13 = scmp.ge.s32.totalorder %s1420_s9, 1 }
  0x13   : > { %p108_p0 = scmp.lt.s32.totalorder %s1420_s9, 4  ;;  %s88_s30 = scalar_lea.sflag [#allocation3], %s87_s20 }
  0x14   : > { %s1324_s2 = sshra.s32 %s99_s26, 4  ;;  %p1328_p2 = pneg %p1500_p12  ;;  %s1325_s2 = int_to_ptr.hbm [resolvable:$true] %s1324_s2 }
  0x15   : > { %s1326_s3 = scalar_lea.hbm %s1325_s2, 4096  ;;  %s1331_s11 = scalar_lea.hbm %s2590_s0, 12288 }
  0x16   : > { %p1327_p1 = scmp.ne.s32.totalorder %s1325_s2, %s1326_s3  ;;  %p1332_p5 = scmp.lt.s32.totalorder %s1325_s2, %s2590_s0 }
  0x17   : > { %p1333_p7 = scmp.lt.s32.totalorder %s1331_s11, %s1326_s3 }
  0x18   : > { %p1329_p3 = pnand %p1328_p2, %p1327_p1 }
  0x19   : > { %p1334_p8 = por %p1333_p7, %p1332_p5 }
  0x1a   : > { %p1330_p4 = pneg %p1329_p3 }
  0x1c   : > { %p1335_p9 = pnand %p1334_p8, %p1330_p4 }
  0x1e   : > { %1338 = shalt.err (!%p1335_p9)
}
  0x1f   : > { %s1422_s16 = smov 512   ;;  %s1423_s20 = smov 32  }
  0x20   : > { %1281 = dma.hbm_to_vmem [thread:$0]  (!%p1500_p12), %s99_s26, 65536, %s101_s28, %s88_s30, %s1422_s16, %s1422_s16, %s1423_s20  }
  0x21   : > { %p109_p1 = pnand %p1261_p13, %p108_p0 }
  0x22   : > { %s1521_s21 = sand.u32 (!%p109_p1), 1, %s1412_s7  }
  0x23   : > { %112 = sbr.rel (%p109_p1) target bundleno = 557 (0x22d), region = 24  ;;  %s1262_s22 = sshll.u32 (!%p109_p1), %s1521_s21, 12 }
  0x24   : > { %s115_s23 = scalar_lea.sflag (!%p109_p1), [#allocation3], %s1521_s21  ;;  %s1525_s24 = scalar_lea.vmem (!%p109_p1), [#allocation2], %s1262_s22 }
  0x28   : > { %1399 = dma.done.wait (%p1479_p6), %s115_s23, 65536  }
  0x29   : > { %1401 = vsyncadd (%p1479_p6), %s115_s23, 4294901760  ;;  %v140_v0 = vld [vmem:[%s1525_s24] sm:$0xff]  ;;  %v141_v1 = vld [vmem:[%s1525_s24 + $0x8] sm:$0xff]  ;;  %s1534_s25 = scalar_lea.vmem [#allocation5], %s1262_s22  ;;  %s1273_s17 = sshll.u32 %s1457_s10, 12 }
  0x2a   : > { %v142_v2 = vld [vmem:[%s1525_s24 + $0x10] sm:$0xff]  ;;  %652 = vst [vmem:[%s1534_s25] sm:$0xff] %v140_v0  ;;  %v143_v3 = vld [vmem:[%s1525_s24 + $0x18] sm:$0xff]  ;;  %v144_v4 = vld [vmem:[%s1525_s24 + $0x20] sm:$0xff]  ;;  %s1177_s28 = scalar_lea.hbm %s2591_s1, %s1273_s17  ;;  %s1178_s10 = sshll.u32 %s1534_s25, 4  ;;  %s1179_s10 = int_to_ptr.vmem [resolvable:$true] %s1178_s10 }
  0x2b   : > { %653 = vst [vmem:[%s1534_s25 + $0x8] sm:$0xff] %v141_v1  ;;  %v145_v5 = vld [vmem:[%s1525_s24 + $0x28] sm:$0xff]  ;;  %v146_v6 = vld [vmem:[%s1525_s24 + $0x30] sm:$0xff]  ;;  %v147_v7 = vld [vmem:[%s1525_s24 + $0x38] sm:$0xff]  ;;  %s1180_s29 = sshll.u32 %s1177_s28, 4  ;;  %s1165_s30 = scalar_lea.sflag [#allocation4], %s1521_s21  ;;  %s1181_s29 = int_to_ptr.hbm [resolvable:$true] %s1180_s29 }
  0x2c   : > { %654 = vst [vmem:[%s1534_s25 + $0x10] sm:$0xff] %v142_v2  ;;  %v148_v8 = vld [vmem:[%s1525_s24 + $0x40] sm:$0xff]  ;;  %v149_v9 = vld [vmem:[%s1525_s24 + $0x48] sm:$0xff]  ;;  %v150_v10 = vld [vmem:[%s1525_s24 + $0x50] sm:$0xff]  ;;  %s1368_s2 = sshra.s32 %s1181_s29, 4  ;;  %s1374_s11 = scalar_lea.hbm %s2591_s1, 12288  ;;  %s1369_s2 = int_to_ptr.hbm [resolvable:$true] %s1368_s2 }
  0x2d   : > { %655 = vst [vmem:[%s1534_s25 + $0x18] sm:$0xff] %v143_v3  ;;  %v151_v11 = vld [vmem:[%s1525_s24 + $0x58] sm:$0xff]  ;;  %v152_v12 = vld [vmem:[%s1525_s24 + $0x60] sm:$0xff]  ;;  %v153_v13 = vld [vmem:[%s1525_s24 + $0x68] sm:$0xff]  ;;  %s1370_s3 = scalar_lea.hbm %s1369_s2, 4096  ;;  %p1375_p0 = scmp.lt.s32.totalorder %s1369_s2, %s2591_s1 }
  0x2e   : > { %656 = vst [vmem:[%s1534_s25 + $0x20] sm:$0xff] %v144_v4  ;;  %v154_v14 = vld [vmem:[%s1525_s24 + $0x70] sm:$0xff]  ;;  %v155_v15 = vld [vmem:[%s1525_s24 + $0x78] sm:$0xff]  ;;  %v156_v16 = vld [vmem:[%s1525_s24 + $0x80] sm:$0xff]  ;;  %p1371_p6 = scmp.ne.s32.totalorder %s1369_s2, %s1370_s3  ;;  %p1376_p2 = scmp.lt.s32.totalorder %s1374_s11, %s1370_s3 }
  0x2f   : > { %657 = vst [vmem:[%s1534_s25 + $0x28] sm:$0xff] %v145_v5  ;;  %v157_v17 = vld [vmem:[%s1525_s24 + $0x88] sm:$0xff]  ;;  %v158_v18 = vld [vmem:[%s1525_s24 + $0x90] sm:$0xff]  ;;  %v159_v19 = vld [vmem:[%s1525_s24 + $0x98] sm:$0xff] }
  0x30   : > { %658 = vst [vmem:[%s1534_s25 + $0x30] sm:$0xff] %v146_v6  ;;  %v160_v20 = vld [vmem:[%s1525_s24 + $0xa0] sm:$0xff]  ;;  %v161_v21 = vld [vmem:[%s1525_s24 + $0xa8] sm:$0xff]  ;;  %v162_v22 = vld [vmem:[%s1525_s24 + $0xb0] sm:$0xff]  ;;  %p1372_p12 = pnand %p1371_p6, %p1485_p10  ;;  %p1377_p3 = por %p1376_p2, %p1375_p0 }
  0x31   : > { %659 = vst [vmem:[%s1534_s25 + $0x38] sm:$0xff] %v147_v7  ;;  %v163_v23 = vld [vmem:[%s1525_s24 + $0xb8] sm:$0xff]  ;;  %v164_v24 = vld [vmem:[%s1525_s24 + $0xc0] sm:$0xff]  ;;  %v165_v25 = vld [vmem:[%s1525_s24 + $0xc8] sm:$0xff] }
  0x32   : > { %660 = vst [vmem:[%s1534_s25 + $0x40] sm:$0xff] %v148_v8  ;;  %v166_v26 = vld [vmem:[%s1525_s24 + $0xd0] sm:$0xff]  ;;  %v167_v27 = vld [vmem:[%s1525_s24 + $0xd8] sm:$0xff]  ;;  %v168_v28 = vld [vmem:[%s1525_s24 + $0xe0] sm:$0xff]  ;;  %p1373_p13 = pneg %p1372_p12 }
  0x33   : > { %661 = vst [vmem:[%s1534_s25 + $0x48] sm:$0xff] %v149_v9  ;;  %v169_v29 = vld [vmem:[%s1525_s24 + $0xe8] sm:$0xff]  ;;  %v170_v30 = vld [vmem:[%s1525_s24 + $0xf0] sm:$0xff]  ;;  %v171_v31 = vld [vmem:[%s1525_s24 + $0xf8] sm:$0xff] }
  0x34   : > { %662 = vst [vmem:[%s1534_s25 + $0x50] sm:$0xff] %v150_v10  ;;  %v172_v32 = vld [vmem:[%s1525_s24 + $0x100] sm:$0xff]  ;;  %v173_v33 = vld [vmem:[%s1525_s24 + $0x108] sm:$0xff]  ;;  %v174_v34 = vld [vmem:[%s1525_s24 + $0x110] sm:$0xff]  ;;  %p1378_p4 = pnand %p1377_p3, %p1373_p13 }
  0x35   : > { %663 = vst [vmem:[%s1534_s25 + $0x58] sm:$0xff] %v151_v11  ;;  %v175_v35 = vld [vmem:[%s1525_s24 + $0x118] sm:$0xff]  ;;  %v176_v36 = vld [vmem:[%s1525_s24 + $0x120] sm:$0xff]  ;;  %v177_v37 = vld [vmem:[%s1525_s24 + $0x128] sm:$0xff] }
  0x36   : > { %664 = vst [vmem:[%s1534_s25 + $0x60] sm:$0xff] %v152_v12  ;;  %v178_v38 = vld [vmem:[%s1525_s24 + $0x130] sm:$0xff]  ;;  %v179_v39 = vld [vmem:[%s1525_s24 + $0x138] sm:$0xff]  ;;  %v180_v40 = vld [vmem:[%s1525_s24 + $0x140] sm:$0xff] }
  0x37   : > { %665 = vst [vmem:[%s1534_s25 + $0x68] sm:$0xff] %v153_v13  ;;  %v181_v41 = vld [vmem:[%s1525_s24 + $0x148] sm:$0xff]  ;;  %v182_v42 = vld [vmem:[%s1525_s24 + $0x150] sm:$0xff]  ;;  %v183_v43 = vld [vmem:[%s1525_s24 + $0x158] sm:$0xff] }
  0x38   : > { %666 = vst [vmem:[%s1534_s25 + $0x70] sm:$0xff] %v154_v14  ;;  %v184_v44 = vld [vmem:[%s1525_s24 + $0x160] sm:$0xff]  ;;  %v185_v45 = vld [vmem:[%s1525_s24 + $0x168] sm:$0xff]  ;;  %v186_v46 = vld [vmem:[%s1525_s24 + $0x170] sm:$0xff] }
  0x39   : > { %667 = vst [vmem:[%s1534_s25 + $0x78] sm:$0xff] %v155_v15  ;;  %v187_v47 = vld [vmem:[%s1525_s24 + $0x178] sm:$0xff]  ;;  %v188_v48 = vld [vmem:[%s1525_s24 + $0x180] sm:$0xff]  ;;  %v189_v49 = vld [vmem:[%s1525_s24 + $0x188] sm:$0xff] }
  0x3a   : > { %668 = vst [vmem:[%s1534_s25 + $0x80] sm:$0xff] %v156_v16  ;;  %v190_v50 = vld [vmem:[%s1525_s24 + $0x190] sm:$0xff]  ;;  %v191_v51 = vld [vmem:[%s1525_s24 + $0x198] sm:$0xff]  ;;  %v192_v52 = vld [vmem:[%s1525_s24 + $0x1a0] sm:$0xff] }
  0x3b   : > { %669 = vst [vmem:[%s1534_s25 + $0x88] sm:$0xff] %v157_v17  ;;  %v193_v53 = vld [vmem:[%s1525_s24 + $0x1a8] sm:$0xff]  ;;  %v194_v54 = vld [vmem:[%s1525_s24 + $0x1b0] sm:$0xff]  ;;  %v195_v55 = vld [vmem:[%s1525_s24 + $0x1b8] sm:$0xff] }
  0x3c   : > { %670 = vst [vmem:[%s1534_s25 + $0x90] sm:$0xff] %v158_v18  ;;  %v196_v56 = vld [vmem:[%s1525_s24 + $0x1c0] sm:$0xff]  ;;  %v197_v57 = vld [vmem:[%s1525_s24 + $0x1c8] sm:$0xff]  ;;  %v198_v58 = vld [vmem:[%s1525_s24 + $0x1d0] sm:$0xff] }
  0x3d   : > { %671 = vst [vmem:[%s1534_s25 + $0x98] sm:$0xff] %v159_v19  ;;  %v199_v59 = vld [vmem:[%s1525_s24 + $0x1d8] sm:$0xff]  ;;  %v200_v60 = vld [vmem:[%s1525_s24 + $0x1e0] sm:$0xff]  ;;  %v201_v61 = vld [vmem:[%s1525_s24 + $0x1e8] sm:$0xff] }
  0x3e   : > { %672 = vst [vmem:[%s1534_s25 + $0xa0] sm:$0xff] %v160_v20  ;;  %v202_v62 = vld [vmem:[%s1525_s24 + $0x1f0] sm:$0xff]  ;;  %v203_v63 = vld [vmem:[%s1525_s24 + $0x1f8] sm:$0xff]  ;;  %v204_v0 = vld [vmem:[%s1525_s24 + $0x200] sm:$0xff] }
  0x3f   : > { %673 = vst [vmem:[%s1534_s25 + $0xa8] sm:$0xff] %v161_v21  ;;  %v205_v1 = vld [vmem:[%s1525_s24 + $0x208] sm:$0xff]  ;;  %v206_v2 = vld [vmem:[%s1525_s24 + $0x210] sm:$0xff]  ;;  %v207_v3 = vld [vmem:[%s1525_s24 + $0x218] sm:$0xff] }
  0x40   : > { %674 = vst [vmem:[%s1534_s25 + $0xb0] sm:$0xff] %v162_v22  ;;  %v208_v4 = vld [vmem:[%s1525_s24 + $0x220] sm:$0xff]  ;;  %v209_v5 = vld [vmem:[%s1525_s24 + $0x228] sm:$0xff]  ;;  %v210_v6 = vld [vmem:[%s1525_s24 + $0x230] sm:$0xff] }
  0x41   : > { %675 = vst [vmem:[%s1534_s25 + $0xb8] sm:$0xff] %v163_v23  ;;  %v211_v7 = vld [vmem:[%s1525_s24 + $0x238] sm:$0xff]  ;;  %v212_v8 = vld [vmem:[%s1525_s24 + $0x240] sm:$0xff]  ;;  %v213_v9 = vld [vmem:[%s1525_s24 + $0x248] sm:$0xff] }
  0x42   : > { %676 = vst [vmem:[%s1534_s25 + $0xc0] sm:$0xff] %v164_v24  ;;  %v214_v10 = vld [vmem:[%s1525_s24 + $0x250] sm:$0xff]  ;;  %v215_v11 = vld [vmem:[%s1525_s24 + $0x258] sm:$0xff]  ;;  %v216_v12 = vld [vmem:[%s1525_s24 + $0x260] sm:$0xff] }
  0x43   : > { %677 = vst [vmem:[%s1534_s25 + $0xc8] sm:$0xff] %v165_v25  ;;  %v217_v13 = vld [vmem:[%s1525_s24 + $0x268] sm:$0xff]  ;;  %v218_v14 = vld [vmem:[%s1525_s24 + $0x270] sm:$0xff]  ;;  %v219_v15 = vld [vmem:[%s1525_s24 + $0x278] sm:$0xff] }
  0x44   : > { %678 = vst [vmem:[%s1534_s25 + $0xd0] sm:$0xff] %v166_v26  ;;  %v220_v16 = vld [vmem:[%s1525_s24 + $0x280] sm:$0xff]  ;;  %v221_v17 = vld [vmem:[%s1525_s24 + $0x288] sm:$0xff]  ;;  %v222_v18 = vld [vmem:[%s1525_s24 + $0x290] sm:$0xff] }
  0x45   : > { %679 = vst [vmem:[%s1534_s25 + $0xd8] sm:$0xff] %v167_v27  ;;  %v223_v19 = vld [vmem:[%s1525_s24 + $0x298] sm:$0xff]  ;;  %v224_v20 = vld [vmem:[%s1525_s24 + $0x2a0] sm:$0xff]  ;;  %v225_v21 = vld [vmem:[%s1525_s24 + $0x2a8] sm:$0xff] }
  0x46   : > { %680 = vst [vmem:[%s1534_s25 + $0xe0] sm:$0xff] %v168_v28  ;;  %v226_v22 = vld [vmem:[%s1525_s24 + $0x2b0] sm:$0xff]  ;;  %v227_v23 = vld [vmem:[%s1525_s24 + $0x2b8] sm:$0xff]  ;;  %v228_v24 = vld [vmem:[%s1525_s24 + $0x2c0] sm:$0xff] }
  0x47   : > { %681 = vst [vmem:[%s1534_s25 + $0xe8] sm:$0xff] %v169_v29  ;;  %v229_v25 = vld [vmem:[%s1525_s24 + $0x2c8] sm:$0xff]  ;;  %v230_v26 = vld [vmem:[%s1525_s24 + $0x2d0] sm:$0xff]  ;;  %v231_v27 = vld [vmem:[%s1525_s24 + $0x2d8] sm:$0xff] }
  0x48   : > { %682 = vst [vmem:[%s1534_s25 + $0xf0] sm:$0xff] %v170_v30  ;;  %v232_v28 = vld [vmem:[%s1525_s24 + $0x2e0] sm:$0xff]  ;;  %v233_v29 = vld [vmem:[%s1525_s24 + $0x2e8] sm:$0xff]  ;;  %v234_v30 = vld [vmem:[%s1525_s24 + $0x2f0] sm:$0xff] }
  0x49   : > { %683 = vst [vmem:[%s1534_s25 + $0xf8] sm:$0xff] %v171_v31  ;;  %v235_v31 = vld [vmem:[%s1525_s24 + $0x2f8] sm:$0xff] }
  0x4a   : > { %684 = vst [vmem:[%s1534_s25 + $0x100] sm:$0xff] %v172_v32  ;;  %v236_v32 = vld [vmem:[%s1525_s24 + $0x300] sm:$0xff] }
  0x4b   : > { %685 = vst [vmem:[%s1534_s25 + $0x108] sm:$0xff] %v173_v33  ;;  %v237_v33 = vld [vmem:[%s1525_s24 + $0x308] sm:$0xff] }
  0x4c   : > { %686 = vst [vmem:[%s1534_s25 + $0x110] sm:$0xff] %v174_v34  ;;  %v238_v34 = vld [vmem:[%s1525_s24 + $0x310] sm:$0xff] }
  0x4d   : > { %687 = vst [vmem:[%s1534_s25 + $0x118] sm:$0xff] %v175_v35  ;;  %v239_v35 = vld [vmem:[%s1525_s24 + $0x318] sm:$0xff] }
  0x4e   : > { %688 = vst [vmem:[%s1534_s25 + $0x120] sm:$0xff] %v176_v36  ;;  %v240_v36 = vld [vmem:[%s1525_s24 + $0x320] sm:$0xff] }
  0x4f   : > { %689 = vst [vmem:[%s1534_s25 + $0x128] sm:$0xff] %v177_v37  ;;  %v241_v37 = vld [vmem:[%s1525_s24 + $0x328] sm:$0xff] }
  0x50   : > { %690 = vst [vmem:[%s1534_s25 + $0x130] sm:$0xff] %v178_v38  ;;  %v242_v38 = vld [vmem:[%s1525_s24 + $0x330] sm:$0xff] }
  0x51   : > { %691 = vst [vmem:[%s1534_s25 + $0x138] sm:$0xff] %v179_v39  ;;  %v243_v39 = vld [vmem:[%s1525_s24 + $0x338] sm:$0xff] }
  0x52   : > { %692 = vst [vmem:[%s1534_s25 + $0x140] sm:$0xff] %v180_v40  ;;  %v244_v40 = vld [vmem:[%s1525_s24 + $0x340] sm:$0xff] }
  0x53   : > { %693 = vst [vmem:[%s1534_s25 + $0x148] sm:$0xff] %v181_v41  ;;  %v245_v41 = vld [vmem:[%s1525_s24 + $0x348] sm:$0xff] }
  0x54   : > { %694 = vst [vmem:[%s1534_s25 + $0x150] sm:$0xff] %v182_v42  ;;  %v246_v42 = vld [vmem:[%s1525_s24 + $0x350] sm:$0xff] }
  0x55   : > { %695 = vst [vmem:[%s1534_s25 + $0x158] sm:$0xff] %v183_v43  ;;  %v247_v43 = vld [vmem:[%s1525_s24 + $0x358] sm:$0xff] }
  0x56   : > { %696 = vst [vmem:[%s1534_s25 + $0x160] sm:$0xff] %v184_v44  ;;  %v248_v44 = vld [vmem:[%s1525_s24 + $0x360] sm:$0xff] }
  0x57   : > { %697 = vst [vmem:[%s1534_s25 + $0x168] sm:$0xff] %v185_v45  ;;  %v249_v45 = vld [vmem:[%s1525_s24 + $0x368] sm:$0xff] }
  0x58   : > { %698 = vst [vmem:[%s1534_s25 + $0x170] sm:$0xff] %v186_v46  ;;  %v250_v46 = vld [vmem:[%s1525_s24 + $0x370] sm:$0xff] }
  0x59   : > { %699 = vst [vmem:[%s1534_s25 + $0x178] sm:$0xff] %v187_v47  ;;  %v251_v47 = vld [vmem:[%s1525_s24 + $0x378] sm:$0xff] }
  0x5a   : > { %700 = vst [vmem:[%s1534_s25 + $0x180] sm:$0xff] %v188_v48  ;;  %v252_v48 = vld [vmem:[%s1525_s24 + $0x380] sm:$0xff] }
  0x5b   : > { %701 = vst [vmem:[%s1534_s25 + $0x188] sm:$0xff] %v189_v49  ;;  %v253_v49 = vld [vmem:[%s1525_s24 + $0x388] sm:$0xff] }
  0x5c   : > { %702 = vst [vmem:[%s1534_s25 + $0x190] sm:$0xff] %v190_v50  ;;  %v254_v50 = vld [vmem:[%s1525_s24 + $0x390] sm:$0xff] }
  0x5d   : > { %703 = vst [vmem:[%s1534_s25 + $0x198] sm:$0xff] %v191_v51  ;;  %v255_v51 = vld [vmem:[%s1525_s24 + $0x398] sm:$0xff] }
  0x5e   : > { %704 = vst [vmem:[%s1534_s25 + $0x1a0] sm:$0xff] %v192_v52  ;;  %v256_v52 = vld [vmem:[%s1525_s24 + $0x3a0] sm:$0xff] }
  0x5f   : > { %705 = vst [vmem:[%s1534_s25 + $0x1a8] sm:$0xff] %v193_v53  ;;  %v257_v53 = vld [vmem:[%s1525_s24 + $0x3a8] sm:$0xff] }
  0x60   : > { %706 = vst [vmem:[%s1534_s25 + $0x1b0] sm:$0xff] %v194_v54  ;;  %v258_v54 = vld [vmem:[%s1525_s24 + $0x3b0] sm:$0xff] }
  0x61   : > { %707 = vst [vmem:[%s1534_s25 + $0x1b8] sm:$0xff] %v195_v55  ;;  %v259_v55 = vld [vmem:[%s1525_s24 + $0x3b8] sm:$0xff] }
  0x62   : > { %708 = vst [vmem:[%s1534_s25 + $0x1c0] sm:$0xff] %v196_v56  ;;  %v260_v56 = vld [vmem:[%s1525_s24 + $0x3c0] sm:$0xff] }
  0x63   : > { %709 = vst [vmem:[%s1534_s25 + $0x1c8] sm:$0xff] %v197_v57  ;;  %v261_v57 = vld [vmem:[%s1525_s24 + $0x3c8] sm:$0xff] }
  0x64   : > { %710 = vst [vmem:[%s1534_s25 + $0x1d0] sm:$0xff] %v198_v58  ;;  %v262_v58 = vld [vmem:[%s1525_s24 + $0x3d0] sm:$0xff] }
  0x65   : > { %711 = vst [vmem:[%s1534_s25 + $0x1d8] sm:$0xff] %v199_v59  ;;  %v263_v59 = vld [vmem:[%s1525_s24 + $0x3d8] sm:$0xff] }
  0x66   : > { %712 = vst [vmem:[%s1534_s25 + $0x1e0] sm:$0xff] %v200_v60  ;;  %v264_v60 = vld [vmem:[%s1525_s24 + $0x3e0] sm:$0xff] }
  0x67   : > { %713 = vst [vmem:[%s1534_s25 + $0x1e8] sm:$0xff] %v201_v61  ;;  %v265_v61 = vld [vmem:[%s1525_s24 + $0x3e8] sm:$0xff] }
  0x68   : > { %714 = vst [vmem:[%s1534_s25 + $0x1f0] sm:$0xff] %v202_v62  ;;  %v266_v62 = vld [vmem:[%s1525_s24 + $0x3f0] sm:$0xff] }
  0x69   : > { %715 = vst [vmem:[%s1534_s25 + $0x1f8] sm:$0xff] %v203_v63  ;;  %v267_v63 = vld [vmem:[%s1525_s24 + $0x3f8] sm:$0xff] }
  0x6a   : > { %716 = vst [vmem:[%s1534_s25 + $0x200] sm:$0xff] %v204_v0  ;;  %v268_v0 = vld [vmem:[%s1525_s24 + $0x400] sm:$0xff] }
  0x6b   : > { %717 = vst [vmem:[%s1534_s25 + $0x208] sm:$0xff] %v205_v1  ;;  %v269_v1 = vld [vmem:[%s1525_s24 + $0x408] sm:$0xff] }
  0x6c   : > { %718 = vst [vmem:[%s1534_s25 + $0x210] sm:$0xff] %v206_v2  ;;  %v270_v2 = vld [vmem:[%s1525_s24 + $0x410] sm:$0xff] }
  0x6d   : > { %719 = vst [vmem:[%s1534_s25 + $0x218] sm:$0xff] %v207_v3  ;;  %v271_v3 = vld [vmem:[%s1525_s24 + $0x418] sm:$0xff] }
  0x6e   : > { %720 = vst [vmem:[%s1534_s25 + $0x220] sm:$0xff] %v208_v4  ;;  %v272_v4 = vld [vmem:[%s1525_s24 + $0x420] sm:$0xff] }
  0x6f   : > { %721 = vst [vmem:[%s1534_s25 + $0x228] sm:$0xff] %v209_v5  ;;  %v273_v5 = vld [vmem:[%s1525_s24 + $0x428] sm:$0xff] }
  0x70   : > { %722 = vst [vmem:[%s1534_s25 + $0x230] sm:$0xff] %v210_v6  ;;  %v274_v6 = vld [vmem:[%s1525_s24 + $0x430] sm:$0xff] }
  0x71   : > { %723 = vst [vmem:[%s1534_s25 + $0x238] sm:$0xff] %v211_v7  ;;  %v275_v7 = vld [vmem:[%s1525_s24 + $0x438] sm:$0xff] }
  0x72   : > { %724 = vst [vmem:[%s1534_s25 + $0x240] sm:$0xff] %v212_v8  ;;  %v276_v8 = vld [vmem:[%s1525_s24 + $0x440] sm:$0xff] }
  0x73   : > { %725 = vst [vmem:[%s1534_s25 + $0x248] sm:$0xff] %v213_v9  ;;  %v277_v9 = vld [vmem:[%s1525_s24 + $0x448] sm:$0xff] }
  0x74   : > { %726 = vst [vmem:[%s1534_s25 + $0x250] sm:$0xff] %v214_v10  ;;  %v278_v10 = vld [vmem:[%s1525_s24 + $0x450] sm:$0xff] }
  0x75   : > { %727 = vst [vmem:[%s1534_s25 + $0x258] sm:$0xff] %v215_v11  ;;  %v279_v11 = vld [vmem:[%s1525_s24 + $0x458] sm:$0xff] }
  0x76   : > { %728 = vst [vmem:[%s1534_s25 + $0x260] sm:$0xff] %v216_v12  ;;  %v280_v12 = vld [vmem:[%s1525_s24 + $0x460] sm:$0xff] }
  0x77   : > { %729 = vst [vmem:[%s1534_s25 + $0x268] sm:$0xff] %v217_v13  ;;  %v281_v13 = vld [vmem:[%s1525_s24 + $0x468] sm:$0xff] }
  0x78   : > { %730 = vst [vmem:[%s1534_s25 + $0x270] sm:$0xff] %v218_v14  ;;  %v282_v14 = vld [vmem:[%s1525_s24 + $0x470] sm:$0xff] }
  0x79   : > { %731 = vst [vmem:[%s1534_s25 + $0x278] sm:$0xff] %v219_v15  ;;  %v283_v15 = vld [vmem:[%s1525_s24 + $0x478] sm:$0xff] }
  0x7a   : > { %732 = vst [vmem:[%s1534_s25 + $0x280] sm:$0xff] %v220_v16  ;;  %v284_v16 = vld [vmem:[%s1525_s24 + $0x480] sm:$0xff] }
  0x7b   : > { %733 = vst [vmem:[%s1534_s25 + $0x288] sm:$0xff] %v221_v17  ;;  %v285_v17 = vld [vmem:[%s1525_s24 + $0x488] sm:$0xff] }
  0x7c   : > { %734 = vst [vmem:[%s1534_s25 + $0x290] sm:$0xff] %v222_v18  ;;  %v286_v18 = vld [vmem:[%s1525_s24 + $0x490] sm:$0xff] }
  0x7d   : > { %735 = vst [vmem:[%s1534_s25 + $0x298] sm:$0xff] %v223_v19  ;;  %v287_v19 = vld [vmem:[%s1525_s24 + $0x498] sm:$0xff] }
  0x7e   : > { %736 = vst [vmem:[%s1534_s25 + $0x2a0] sm:$0xff] %v224_v20  ;;  %v288_v20 = vld [vmem:[%s1525_s24 + $0x4a0] sm:$0xff] }
  0x7f   : > { %737 = vst [vmem:[%s1534_s25 + $0x2a8] sm:$0xff] %v225_v21  ;;  %v289_v21 = vld [vmem:[%s1525_s24 + $0x4a8] sm:$0xff] }
  0x80   : > { %738 = vst [vmem:[%s1534_s25 + $0x2b0] sm:$0xff] %v226_v22  ;;  %v290_v22 = vld [vmem:[%s1525_s24 + $0x4b0] sm:$0xff] }
  0x81   : > { %739 = vst [vmem:[%s1534_s25 + $0x2b8] sm:$0xff] %v227_v23  ;;  %v291_v23 = vld [vmem:[%s1525_s24 + $0x4b8] sm:$0xff] }
  0x82   : > { %740 = vst [vmem:[%s1534_s25 + $0x2c0] sm:$0xff] %v228_v24  ;;  %v292_v24 = vld [vmem:[%s1525_s24 + $0x4c0] sm:$0xff] }
  0x83   : > { %741 = vst [vmem:[%s1534_s25 + $0x2c8] sm:$0xff] %v229_v25  ;;  %v293_v25 = vld [vmem:[%s1525_s24 + $0x4c8] sm:$0xff] }
  0x84   : > { %742 = vst [vmem:[%s1534_s25 + $0x2d0] sm:$0xff] %v230_v26  ;;  %v294_v26 = vld [vmem:[%s1525_s24 + $0x4d0] sm:$0xff] }
  0x85   : > { %743 = vst [vmem:[%s1534_s25 + $0x2d8] sm:$0xff] %v231_v27  ;;  %v295_v27 = vld [vmem:[%s1525_s24 + $0x4d8] sm:$0xff] }
  0x86   : > { %744 = vst [vmem:[%s1534_s25 + $0x2e0] sm:$0xff] %v232_v28  ;;  %v296_v28 = vld [vmem:[%s1525_s24 + $0x4e0] sm:$0xff] }
  0x87   : > { %745 = vst [vmem:[%s1534_s25 + $0x2e8] sm:$0xff] %v233_v29  ;;  %v297_v29 = vld [vmem:[%s1525_s24 + $0x4e8] sm:$0xff] }
  0x88   : > { %746 = vst [vmem:[%s1534_s25 + $0x2f0] sm:$0xff] %v234_v30  ;;  %v298_v30 = vld [vmem:[%s1525_s24 + $0x4f0] sm:$0xff] }
  0x89   : > { %747 = vst [vmem:[%s1534_s25 + $0x2f8] sm:$0xff] %v235_v31  ;;  %v299_v31 = vld [vmem:[%s1525_s24 + $0x4f8] sm:$0xff] }
  0x8a   : > { %748 = vst [vmem:[%s1534_s25 + $0x300] sm:$0xff] %v236_v32  ;;  %v300_v32 = vld [vmem:[%s1525_s24 + $0x500] sm:$0xff] }
  0x8b   : > { %749 = vst [vmem:[%s1534_s25 + $0x308] sm:$0xff] %v237_v33  ;;  %v301_v33 = vld [vmem:[%s1525_s24 + $0x508] sm:$0xff] }
  0x8c   : > { %750 = vst [vmem:[%s1534_s25 + $0x310] sm:$0xff] %v238_v34  ;;  %v302_v34 = vld [vmem:[%s1525_s24 + $0x510] sm:$0xff] }
  0x8d   : > { %751 = vst [vmem:[%s1534_s25 + $0x318] sm:$0xff] %v239_v35  ;;  %v303_v35 = vld [vmem:[%s1525_s24 + $0x518] sm:$0xff] }
  0x8e   : > { %752 = vst [vmem:[%s1534_s25 + $0x320] sm:$0xff] %v240_v36  ;;  %v304_v36 = vld [vmem:[%s1525_s24 + $0x520] sm:$0xff] }
  0x8f   : > { %753 = vst [vmem:[%s1534_s25 + $0x328] sm:$0xff] %v241_v37  ;;  %v305_v37 = vld [vmem:[%s1525_s24 + $0x528] sm:$0xff] }
  0x90   : > { %754 = vst [vmem:[%s1534_s25 + $0x330] sm:$0xff] %v242_v38  ;;  %v306_v38 = vld [vmem:[%s1525_s24 + $0x530] sm:$0xff] }
  0x91   : > { %755 = vst [vmem:[%s1534_s25 + $0x338] sm:$0xff] %v243_v39  ;;  %v307_v39 = vld [vmem:[%s1525_s24 + $0x538] sm:$0xff] }
  0x92   : > { %756 = vst [vmem:[%s1534_s25 + $0x340] sm:$0xff] %v244_v40  ;;  %v308_v40 = vld [vmem:[%s1525_s24 + $0x540] sm:$0xff] }
  0x93   : > { %757 = vst [vmem:[%s1534_s25 + $0x348] sm:$0xff] %v245_v41  ;;  %v309_v41 = vld [vmem:[%s1525_s24 + $0x548] sm:$0xff] }
  0x94   : > { %758 = vst [vmem:[%s1534_s25 + $0x350] sm:$0xff] %v246_v42  ;;  %v310_v42 = vld [vmem:[%s1525_s24 + $0x550] sm:$0xff] }
  0x95   : > { %759 = vst [vmem:[%s1534_s25 + $0x358] sm:$0xff] %v247_v43  ;;  %v311_v43 = vld [vmem:[%s1525_s24 + $0x558] sm:$0xff] }
  0x96   : > { %760 = vst [vmem:[%s1534_s25 + $0x360] sm:$0xff] %v248_v44  ;;  %v312_v44 = vld [vmem:[%s1525_s24 + $0x560] sm:$0xff] }
  0x97   : > { %761 = vst [vmem:[%s1534_s25 + $0x368] sm:$0xff] %v249_v45  ;;  %v313_v45 = vld [vmem:[%s1525_s24 + $0x568] sm:$0xff] }
  0x98   : > { %762 = vst [vmem:[%s1534_s25 + $0x370] sm:$0xff] %v250_v46  ;;  %v314_v46 = vld [vmem:[%s1525_s24 + $0x570] sm:$0xff] }
  0x99   : > { %763 = vst [vmem:[%s1534_s25 + $0x378] sm:$0xff] %v251_v47  ;;  %v315_v47 = vld [vmem:[%s1525_s24 + $0x578] sm:$0xff] }
  0x9a   : > { %764 = vst [vmem:[%s1534_s25 + $0x380] sm:$0xff] %v252_v48  ;;  %v316_v48 = vld [vmem:[%s1525_s24 + $0x580] sm:$0xff] }
  0x9b   : > { %765 = vst [vmem:[%s1534_s25 + $0x388] sm:$0xff] %v253_v49  ;;  %v317_v49 = vld [vmem:[%s1525_s24 + $0x588] sm:$0xff] }
  0x9c   : > { %766 = vst [vmem:[%s1534_s25 + $0x390] sm:$0xff] %v254_v50  ;;  %v318_v50 = vld [vmem:[%s1525_s24 + $0x590] sm:$0xff] }
  0x9d   : > { %767 = vst [vmem:[%s1534_s25 + $0x398] sm:$0xff] %v255_v51  ;;  %v319_v51 = vld [vmem:[%s1525_s24 + $0x598] sm:$0xff] }
  0x9e   : > { %768 = vst [vmem:[%s1534_s25 + $0x3a0] sm:$0xff] %v256_v52  ;;  %v320_v52 = vld [vmem:[%s1525_s24 + $0x5a0] sm:$0xff] }
  0x9f   : > { %769 = vst [vmem:[%s1534_s25 + $0x3a8] sm:$0xff] %v257_v53  ;;  %v321_v53 = vld [vmem:[%s1525_s24 + $0x5a8] sm:$0xff] }
  0xa0   : > { %770 = vst [vmem:[%s1534_s25 + $0x3b0] sm:$0xff] %v258_v54  ;;  %v322_v54 = vld [vmem:[%s1525_s24 + $0x5b0] sm:$0xff] }
  0xa1   : > { %771 = vst [vmem:[%s1534_s25 + $0x3b8] sm:$0xff] %v259_v55  ;;  %v323_v55 = vld [vmem:[%s1525_s24 + $0x5b8] sm:$0xff] }
  0xa2   : > { %772 = vst [vmem:[%s1534_s25 + $0x3c0] sm:$0xff] %v260_v56  ;;  %v324_v56 = vld [vmem:[%s1525_s24 + $0x5c0] sm:$0xff] }
  0xa3   : > { %773 = vst [vmem:[%s1534_s25 + $0x3c8] sm:$0xff] %v261_v57  ;;  %v325_v57 = vld [vmem:[%s1525_s24 + $0x5c8] sm:$0xff] }
  0xa4   : > { %774 = vst [vmem:[%s1534_s25 + $0x3d0] sm:$0xff] %v262_v58  ;;  %v326_v58 = vld [vmem:[%s1525_s24 + $0x5d0] sm:$0xff] }
  0xa5   : > { %775 = vst [vmem:[%s1534_s25 + $0x3d8] sm:$0xff] %v263_v59  ;;  %v327_v59 = vld [vmem:[%s1525_s24 + $0x5d8] sm:$0xff] }
  0xa6   : > { %776 = vst [vmem:[%s1534_s25 + $0x3e0] sm:$0xff] %v264_v60  ;;  %v328_v60 = vld [vmem:[%s1525_s24 + $0x5e0] sm:$0xff] }
  0xa7   : > { %777 = vst [vmem:[%s1534_s25 + $0x3e8] sm:$0xff] %v265_v61  ;;  %v329_v61 = vld [vmem:[%s1525_s24 + $0x5e8] sm:$0xff] }
  0xa8   : > { %778 = vst [vmem:[%s1534_s25 + $0x3f0] sm:$0xff] %v266_v62  ;;  %v330_v62 = vld [vmem:[%s1525_s24 + $0x5f0] sm:$0xff] }
  0xa9   : > { %779 = vst [vmem:[%s1534_s25 + $0x3f8] sm:$0xff] %v267_v63  ;;  %v331_v63 = vld [vmem:[%s1525_s24 + $0x5f8] sm:$0xff] }
  0xaa   : > { %780 = vst [vmem:[%s1534_s25 + $0x400] sm:$0xff] %v268_v0  ;;  %v332_v0 = vld [vmem:[%s1525_s24 + $0x600] sm:$0xff] }
  0xab   : > { %781 = vst [vmem:[%s1534_s25 + $0x408] sm:$0xff] %v269_v1  ;;  %v333_v1 = vld [vmem:[%s1525_s24 + $0x608] sm:$0xff] }
  0xac   : > { %782 = vst [vmem:[%s1534_s25 + $0x410] sm:$0xff] %v270_v2  ;;  %v334_v2 = vld [vmem:[%s1525_s24 + $0x610] sm:$0xff] }
  0xad   : > { %783 = vst [vmem:[%s1534_s25 + $0x418] sm:$0xff] %v271_v3  ;;  %v335_v3 = vld [vmem:[%s1525_s24 + $0x618] sm:$0xff] }
  0xae   : > { %784 = vst [vmem:[%s1534_s25 + $0x420] sm:$0xff] %v272_v4  ;;  %v336_v4 = vld [vmem:[%s1525_s24 + $0x620] sm:$0xff] }
  0xaf   : > { %785 = vst [vmem:[%s1534_s25 + $0x428] sm:$0xff] %v273_v5  ;;  %v337_v5 = vld [vmem:[%s1525_s24 + $0x628] sm:$0xff] }
  0xb0   : > { %786 = vst [vmem:[%s1534_s25 + $0x430] sm:$0xff] %v274_v6  ;;  %v338_v6 = vld [vmem:[%s1525_s24 + $0x630] sm:$0xff] }
  0xb1   : > { %787 = vst [vmem:[%s1534_s25 + $0x438] sm:$0xff] %v275_v7  ;;  %v339_v7 = vld [vmem:[%s1525_s24 + $0x638] sm:$0xff] }
  0xb2   : > { %788 = vst [vmem:[%s1534_s25 + $0x440] sm:$0xff] %v276_v8  ;;  %v340_v8 = vld [vmem:[%s1525_s24 + $0x640] sm:$0xff] }
  0xb3   : > { %789 = vst [vmem:[%s1534_s25 + $0x448] sm:$0xff] %v277_v9  ;;  %v341_v9 = vld [vmem:[%s1525_s24 + $0x648] sm:$0xff] }
  0xb4   : > { %790 = vst [vmem:[%s1534_s25 + $0x450] sm:$0xff] %v278_v10  ;;  %v342_v10 = vld [vmem:[%s1525_s24 + $0x650] sm:$0xff] }
  0xb5   : > { %791 = vst [vmem:[%s1534_s25 + $0x458] sm:$0xff] %v279_v11  ;;  %v343_v11 = vld [vmem:[%s1525_s24 + $0x658] sm:$0xff] }
  0xb6   : > { %792 = vst [vmem:[%s1534_s25 + $0x460] sm:$0xff] %v280_v12  ;;  %v344_v12 = vld [vmem:[%s1525_s24 + $0x660] sm:$0xff] }
  0xb7   : > { %793 = vst [vmem:[%s1534_s25 + $0x468] sm:$0xff] %v281_v13  ;;  %v345_v13 = vld [vmem:[%s1525_s24 + $0x668] sm:$0xff] }
  0xb8   : > { %794 = vst [vmem:[%s1534_s25 + $0x470] sm:$0xff] %v282_v14  ;;  %v346_v14 = vld [vmem:[%s1525_s24 + $0x670] sm:$0xff] }
  0xb9   : > { %795 = vst [vmem:[%s1534_s25 + $0x478] sm:$0xff] %v283_v15  ;;  %v347_v15 = vld [vmem:[%s1525_s24 + $0x678] sm:$0xff] }
  0xba   : > { %796 = vst [vmem:[%s1534_s25 + $0x480] sm:$0xff] %v284_v16  ;;  %v348_v16 = vld [vmem:[%s1525_s24 + $0x680] sm:$0xff] }
  0xbb   : > { %797 = vst [vmem:[%s1534_s25 + $0x488] sm:$0xff] %v285_v17  ;;  %v349_v17 = vld [vmem:[%s1525_s24 + $0x688] sm:$0xff] }
  0xbc   : > { %798 = vst [vmem:[%s1534_s25 + $0x490] sm:$0xff] %v286_v18  ;;  %v350_v18 = vld [vmem:[%s1525_s24 + $0x690] sm:$0xff] }
  0xbd   : > { %799 = vst [vmem:[%s1534_s25 + $0x498] sm:$0xff] %v287_v19  ;;  %v351_v19 = vld [vmem:[%s1525_s24 + $0x698] sm:$0xff] }
  0xbe   : > { %800 = vst [vmem:[%s1534_s25 + $0x4a0] sm:$0xff] %v288_v20  ;;  %v352_v20 = vld [vmem:[%s1525_s24 + $0x6a0] sm:$0xff] }
  0xbf   : > { %801 = vst [vmem:[%s1534_s25 + $0x4a8] sm:$0xff] %v289_v21  ;;  %v353_v21 = vld [vmem:[%s1525_s24 + $0x6a8] sm:$0xff] }
  0xc0   : > { %802 = vst [vmem:[%s1534_s25 + $0x4b0] sm:$0xff] %v290_v22  ;;  %v354_v22 = vld [vmem:[%s1525_s24 + $0x6b0] sm:$0xff] }
  0xc1   : > { %803 = vst [vmem:[%s1534_s25 + $0x4b8] sm:$0xff] %v291_v23  ;;  %v355_v23 = vld [vmem:[%s1525_s24 + $0x6b8] sm:$0xff] }
  0xc2   : > { %804 = vst [vmem:[%s1534_s25 + $0x4c0] sm:$0xff] %v292_v24  ;;  %v356_v24 = vld [vmem:[%s1525_s24 + $0x6c0] sm:$0xff] }
  0xc3   : > { %805 = vst [vmem:[%s1534_s25 + $0x4c8] sm:$0xff] %v293_v25  ;;  %v357_v25 = vld [vmem:[%s1525_s24 + $0x6c8] sm:$0xff] }
  0xc4   : > { %806 = vst [vmem:[%s1534_s25 + $0x4d0] sm:$0xff] %v294_v26  ;;  %v358_v26 = vld [vmem:[%s1525_s24 + $0x6d0] sm:$0xff] }
  0xc5   : > { %807 = vst [vmem:[%s1534_s25 + $0x4d8] sm:$0xff] %v295_v27  ;;  %v359_v27 = vld [vmem:[%s1525_s24 + $0x6d8] sm:$0xff] }
  0xc6   : > { %808 = vst [vmem:[%s1534_s25 + $0x4e0] sm:$0xff] %v296_v28  ;;  %v360_v28 = vld [vmem:[%s1525_s24 + $0x6e0] sm:$0xff] }
  0xc7   : > { %809 = vst [vmem:[%s1534_s25 + $0x4e8] sm:$0xff] %v297_v29  ;;  %v361_v29 = vld [vmem:[%s1525_s24 + $0x6e8] sm:$0xff] }
  0xc8   : > { %810 = vst [vmem:[%s1534_s25 + $0x4f0] sm:$0xff] %v298_v30  ;;  %v362_v30 = vld [vmem:[%s1525_s24 + $0x6f0] sm:$0xff] }
  0xc9   : > { %811 = vst [vmem:[%s1534_s25 + $0x4f8] sm:$0xff] %v299_v31  ;;  %v363_v31 = vld [vmem:[%s1525_s24 + $0x6f8] sm:$0xff] }
  0xca   : > { %812 = vst [vmem:[%s1534_s25 + $0x500] sm:$0xff] %v300_v32  ;;  %v364_v32 = vld [vmem:[%s1525_s24 + $0x700] sm:$0xff] }
  0xcb   : > { %813 = vst [vmem:[%s1534_s25 + $0x508] sm:$0xff] %v301_v33  ;;  %v365_v33 = vld [vmem:[%s1525_s24 + $0x708] sm:$0xff] }
  0xcc   : > { %814 = vst [vmem:[%s1534_s25 + $0x510] sm:$0xff] %v302_v34  ;;  %v366_v34 = vld [vmem:[%s1525_s24 + $0x710] sm:$0xff] }
  0xcd   : > { %815 = vst [vmem:[%s1534_s25 + $0x518] sm:$0xff] %v303_v35  ;;  %v367_v35 = vld [vmem:[%s1525_s24 + $0x718] sm:$0xff] }
  0xce   : > { %816 = vst [vmem:[%s1534_s25 + $0x520] sm:$0xff] %v304_v36  ;;  %v368_v36 = vld [vmem:[%s1525_s24 + $0x720] sm:$0xff] }
  0xcf   : > { %817 = vst [vmem:[%s1534_s25 + $0x528] sm:$0xff] %v305_v37  ;;  %v369_v37 = vld [vmem:[%s1525_s24 + $0x728] sm:$0xff] }
  0xd0   : > { %818 = vst [vmem:[%s1534_s25 + $0x530] sm:$0xff] %v306_v38  ;;  %v370_v38 = vld [vmem:[%s1525_s24 + $0x730] sm:$0xff] }
  0xd1   : > { %819 = vst [vmem:[%s1534_s25 + $0x538] sm:$0xff] %v307_v39  ;;  %v371_v39 = vld [vmem:[%s1525_s24 + $0x738] sm:$0xff] }
  0xd2   : > { %820 = vst [vmem:[%s1534_s25 + $0x540] sm:$0xff] %v308_v40  ;;  %v372_v40 = vld [vmem:[%s1525_s24 + $0x740] sm:$0xff] }
  0xd3   : > { %821 = vst [vmem:[%s1534_s25 + $0x548] sm:$0xff] %v309_v41  ;;  %v373_v41 = vld [vmem:[%s1525_s24 + $0x748] sm:$0xff] }
  0xd4   : > { %822 = vst [vmem:[%s1534_s25 + $0x550] sm:$0xff] %v310_v42  ;;  %v374_v42 = vld [vmem:[%s1525_s24 + $0x750] sm:$0xff] }
  0xd5   : > { %823 = vst [vmem:[%s1534_s25 + $0x558] sm:$0xff] %v311_v43  ;;  %v375_v43 = vld [vmem:[%s1525_s24 + $0x758] sm:$0xff] }
  0xd6   : > { %824 = vst [vmem:[%s1534_s25 + $0x560] sm:$0xff] %v312_v44  ;;  %v376_v44 = vld [vmem:[%s1525_s24 + $0x760] sm:$0xff] }
  0xd7   : > { %825 = vst [vmem:[%s1534_s25 + $0x568] sm:$0xff] %v313_v45  ;;  %v377_v45 = vld [vmem:[%s1525_s24 + $0x768] sm:$0xff] }
  0xd8   : > { %826 = vst [vmem:[%s1534_s25 + $0x570] sm:$0xff] %v314_v46  ;;  %v378_v46 = vld [vmem:[%s1525_s24 + $0x770] sm:$0xff] }
  0xd9   : > { %827 = vst [vmem:[%s1534_s25 + $0x578] sm:$0xff] %v315_v47  ;;  %v379_v47 = vld [vmem:[%s1525_s24 + $0x778] sm:$0xff] }
  0xda   : > { %828 = vst [vmem:[%s1534_s25 + $0x580] sm:$0xff] %v316_v48  ;;  %v380_v48 = vld [vmem:[%s1525_s24 + $0x780] sm:$0xff] }
  0xdb   : > { %829 = vst [vmem:[%s1534_s25 + $0x588] sm:$0xff] %v317_v49  ;;  %v381_v49 = vld [vmem:[%s1525_s24 + $0x788] sm:$0xff] }
  0xdc   : > { %830 = vst [vmem:[%s1534_s25 + $0x590] sm:$0xff] %v318_v50  ;;  %v382_v50 = vld [vmem:[%s1525_s24 + $0x790] sm:$0xff] }
  0xdd   : > { %831 = vst [vmem:[%s1534_s25 + $0x598] sm:$0xff] %v319_v51  ;;  %v383_v51 = vld [vmem:[%s1525_s24 + $0x798] sm:$0xff] }
  0xde   : > { %832 = vst [vmem:[%s1534_s25 + $0x5a0] sm:$0xff] %v320_v52  ;;  %v384_v52 = vld [vmem:[%s1525_s24 + $0x7a0] sm:$0xff] }
  0xdf   : > { %833 = vst [vmem:[%s1534_s25 + $0x5a8] sm:$0xff] %v321_v53  ;;  %v385_v53 = vld [vmem:[%s1525_s24 + $0x7a8] sm:$0xff] }
  0xe0   : > { %834 = vst [vmem:[%s1534_s25 + $0x5b0] sm:$0xff] %v322_v54  ;;  %v386_v54 = vld [vmem:[%s1525_s24 + $0x7b0] sm:$0xff] }
  0xe1   : > { %835 = vst [vmem:[%s1534_s25 + $0x5b8] sm:$0xff] %v323_v55  ;;  %v387_v55 = vld [vmem:[%s1525_s24 + $0x7b8] sm:$0xff] }
  0xe2   : > { %836 = vst [vmem:[%s1534_s25 + $0x5c0] sm:$0xff] %v324_v56  ;;  %v388_v56 = vld [vmem:[%s1525_s24 + $0x7c0] sm:$0xff] }
  0xe3   : > { %837 = vst [vmem:[%s1534_s25 + $0x5c8] sm:$0xff] %v325_v57  ;;  %v389_v57 = vld [vmem:[%s1525_s24 + $0x7c8] sm:$0xff] }
  0xe4   : > { %838 = vst [vmem:[%s1534_s25 + $0x5d0] sm:$0xff] %v326_v58  ;;  %v390_v58 = vld [vmem:[%s1525_s24 + $0x7d0] sm:$0xff] }
  0xe5   : > { %839 = vst [vmem:[%s1534_s25 + $0x5d8] sm:$0xff] %v327_v59  ;;  %v391_v59 = vld [vmem:[%s1525_s24 + $0x7d8] sm:$0xff] }
  0xe6   : > { %840 = vst [vmem:[%s1534_s25 + $0x5e0] sm:$0xff] %v328_v60  ;;  %v392_v60 = vld [vmem:[%s1525_s24 + $0x7e0] sm:$0xff] }
  0xe7   : > { %841 = vst [vmem:[%s1534_s25 + $0x5e8] sm:$0xff] %v329_v61  ;;  %v393_v61 = vld [vmem:[%s1525_s24 + $0x7e8] sm:$0xff] }
  0xe8   : > { %842 = vst [vmem:[%s1534_s25 + $0x5f0] sm:$0xff] %v330_v62  ;;  %v394_v62 = vld [vmem:[%s1525_s24 + $0x7f0] sm:$0xff] }
  0xe9   : > { %843 = vst [vmem:[%s1534_s25 + $0x5f8] sm:$0xff] %v331_v63  ;;  %v395_v63 = vld [vmem:[%s1525_s24 + $0x7f8] sm:$0xff] }
  0xea   : > { %844 = vst [vmem:[%s1534_s25 + $0x600] sm:$0xff] %v332_v0  ;;  %v396_v0 = vld [vmem:[%s1525_s24 + $0x800] sm:$0xff] }
  0xeb   : > { %845 = vst [vmem:[%s1534_s25 + $0x608] sm:$0xff] %v333_v1  ;;  %v397_v1 = vld [vmem:[%s1525_s24 + $0x808] sm:$0xff] }
  0xec   : > { %846 = vst [vmem:[%s1534_s25 + $0x610] sm:$0xff] %v334_v2  ;;  %v398_v2 = vld [vmem:[%s1525_s24 + $0x810] sm:$0xff] }
  0xed   : > { %847 = vst [vmem:[%s1534_s25 + $0x618] sm:$0xff] %v335_v3  ;;  %v399_v3 = vld [vmem:[%s1525_s24 + $0x818] sm:$0xff] }
  0xee   : > { %848 = vst [vmem:[%s1534_s25 + $0x620] sm:$0xff] %v336_v4  ;;  %v400_v4 = vld [vmem:[%s1525_s24 + $0x820] sm:$0xff] }
  0xef   : > { %849 = vst [vmem:[%s1534_s25 + $0x628] sm:$0xff] %v337_v5  ;;  %v401_v5 = vld [vmem:[%s1525_s24 + $0x828] sm:$0xff] }
  0xf0   : > { %850 = vst [vmem:[%s1534_s25 + $0x630] sm:$0xff] %v338_v6  ;;  %v402_v6 = vld [vmem:[%s1525_s24 + $0x830] sm:$0xff] }
  0xf1   : > { %851 = vst [vmem:[%s1534_s25 + $0x638] sm:$0xff] %v339_v7  ;;  %v403_v7 = vld [vmem:[%s1525_s24 + $0x838] sm:$0xff] }
  0xf2   : > { %852 = vst [vmem:[%s1534_s25 + $0x640] sm:$0xff] %v340_v8  ;;  %v404_v8 = vld [vmem:[%s1525_s24 + $0x840] sm:$0xff] }
  0xf3   : > { %853 = vst [vmem:[%s1534_s25 + $0x648] sm:$0xff] %v341_v9  ;;  %v405_v9 = vld [vmem:[%s1525_s24 + $0x848] sm:$0xff] }
  0xf4   : > { %854 = vst [vmem:[%s1534_s25 + $0x650] sm:$0xff] %v342_v10  ;;  %v406_v10 = vld [vmem:[%s1525_s24 + $0x850] sm:$0xff] }
  0xf5   : > { %855 = vst [vmem:[%s1534_s25 + $0x658] sm:$0xff] %v343_v11  ;;  %v407_v11 = vld [vmem:[%s1525_s24 + $0x858] sm:$0xff] }
  0xf6   : > { %856 = vst [vmem:[%s1534_s25 + $0x660] sm:$0xff] %v344_v12  ;;  %v408_v12 = vld [vmem:[%s1525_s24 + $0x860] sm:$0xff] }
  0xf7   : > { %857 = vst [vmem:[%s1534_s25 + $0x668] sm:$0xff] %v345_v13  ;;  %v409_v13 = vld [vmem:[%s1525_s24 + $0x868] sm:$0xff] }
  0xf8   : > { %858 = vst [vmem:[%s1534_s25 + $0x670] sm:$0xff] %v346_v14  ;;  %v410_v14 = vld [vmem:[%s1525_s24 + $0x870] sm:$0xff] }
  0xf9   : > { %859 = vst [vmem:[%s1534_s25 + $0x678] sm:$0xff] %v347_v15  ;;  %v411_v15 = vld [vmem:[%s1525_s24 + $0x878] sm:$0xff] }
  0xfa   : > { %860 = vst [vmem:[%s1534_s25 + $0x680] sm:$0xff] %v348_v16  ;;  %v412_v16 = vld [vmem:[%s1525_s24 + $0x880] sm:$0xff] }
  0xfb   : > { %861 = vst [vmem:[%s1534_s25 + $0x688] sm:$0xff] %v349_v17  ;;  %v413_v17 = vld [vmem:[%s1525_s24 + $0x888] sm:$0xff] }
  0xfc   : > { %862 = vst [vmem:[%s1534_s25 + $0x690] sm:$0xff] %v350_v18  ;;  %v414_v18 = vld [vmem:[%s1525_s24 + $0x890] sm:$0xff] }
  0xfd   : > { %863 = vst [vmem:[%s1534_s25 + $0x698] sm:$0xff] %v351_v19  ;;  %v415_v19 = vld [vmem:[%s1525_s24 + $0x898] sm:$0xff] }
  0xfe   : > { %864 = vst [vmem:[%s1534_s25 + $0x6a0] sm:$0xff] %v352_v20  ;;  %v416_v20 = vld [vmem:[%s1525_s24 + $0x8a0] sm:$0xff] }
  0xff   : > { %865 = vst [vmem:[%s1534_s25 + $0x6a8] sm:$0xff] %v353_v21  ;;  %v417_v21 = vld [vmem:[%s1525_s24 + $0x8a8] sm:$0xff] }
 0x100   : > { %866 = vst [vmem:[%s1534_s25 + $0x6b0] sm:$0xff] %v354_v22  ;;  %v418_v22 = vld [vmem:[%s1525_s24 + $0x8b0] sm:$0xff] }
 0x101   : > { %867 = vst [vmem:[%s1534_s25 + $0x6b8] sm:$0xff] %v355_v23  ;;  %v419_v23 = vld [vmem:[%s1525_s24 + $0x8b8] sm:$0xff] }
 0x102   : > { %868 = vst [vmem:[%s1534_s25 + $0x6c0] sm:$0xff] %v356_v24  ;;  %v420_v24 = vld [vmem:[%s1525_s24 + $0x8c0] sm:$0xff] }
 0x103   : > { %869 = vst [vmem:[%s1534_s25 + $0x6c8] sm:$0xff] %v357_v25  ;;  %v421_v25 = vld [vmem:[%s1525_s24 + $0x8c8] sm:$0xff] }
 0x104   : > { %870 = vst [vmem:[%s1534_s25 + $0x6d0] sm:$0xff] %v358_v26  ;;  %v422_v26 = vld [vmem:[%s1525_s24 + $0x8d0] sm:$0xff] }
 0x105   : > { %871 = vst [vmem:[%s1534_s25 + $0x6d8] sm:$0xff] %v359_v27  ;;  %v423_v27 = vld [vmem:[%s1525_s24 + $0x8d8] sm:$0xff] }
 0x106   : > { %872 = vst [vmem:[%s1534_s25 + $0x6e0] sm:$0xff] %v360_v28  ;;  %v424_v28 = vld [vmem:[%s1525_s24 + $0x8e0] sm:$0xff] }
 0x107   : > { %873 = vst [vmem:[%s1534_s25 + $0x6e8] sm:$0xff] %v361_v29  ;;  %v425_v29 = vld [vmem:[%s1525_s24 + $0x8e8] sm:$0xff] }
 0x108   : > { %874 = vst [vmem:[%s1534_s25 + $0x6f0] sm:$0xff] %v362_v30  ;;  %v426_v30 = vld [vmem:[%s1525_s24 + $0x8f0] sm:$0xff] }
 0x109   : > { %875 = vst [vmem:[%s1534_s25 + $0x6f8] sm:$0xff] %v363_v31  ;;  %v427_v31 = vld [vmem:[%s1525_s24 + $0x8f8] sm:$0xff] }
 0x10a   : > { %876 = vst [vmem:[%s1534_s25 + $0x700] sm:$0xff] %v364_v32  ;;  %v428_v32 = vld [vmem:[%s1525_s24 + $0x900] sm:$0xff] }
 0x10b   : > { %877 = vst [vmem:[%s1534_s25 + $0x708] sm:$0xff] %v365_v33  ;;  %v429_v33 = vld [vmem:[%s1525_s24 + $0x908] sm:$0xff] }
 0x10c   : > { %878 = vst [vmem:[%s1534_s25 + $0x710] sm:$0xff] %v366_v34  ;;  %v430_v34 = vld [vmem:[%s1525_s24 + $0x910] sm:$0xff] }
 0x10d   : > { %879 = vst [vmem:[%s1534_s25 + $0x718] sm:$0xff] %v367_v35  ;;  %v431_v35 = vld [vmem:[%s1525_s24 + $0x918] sm:$0xff] }
 0x10e   : > { %880 = vst [vmem:[%s1534_s25 + $0x720] sm:$0xff] %v368_v36  ;;  %v432_v36 = vld [vmem:[%s1525_s24 + $0x920] sm:$0xff] }
 0x10f   : > { %881 = vst [vmem:[%s1534_s25 + $0x728] sm:$0xff] %v369_v37  ;;  %v433_v37 = vld [vmem:[%s1525_s24 + $0x928] sm:$0xff] }
 0x110   : > { %882 = vst [vmem:[%s1534_s25 + $0x730] sm:$0xff] %v370_v38  ;;  %v434_v38 = vld [vmem:[%s1525_s24 + $0x930] sm:$0xff] }
 0x111   : > { %883 = vst [vmem:[%s1534_s25 + $0x738] sm:$0xff] %v371_v39  ;;  %v435_v39 = vld [vmem:[%s1525_s24 + $0x938] sm:$0xff] }
 0x112   : > { %884 = vst [vmem:[%s1534_s25 + $0x740] sm:$0xff] %v372_v40  ;;  %v436_v40 = vld [vmem:[%s1525_s24 + $0x940] sm:$0xff] }
 0x113   : > { %885 = vst [vmem:[%s1534_s25 + $0x748] sm:$0xff] %v373_v41  ;;  %v437_v41 = vld [vmem:[%s1525_s24 + $0x948] sm:$0xff] }
 0x114   : > { %886 = vst [vmem:[%s1534_s25 + $0x750] sm:$0xff] %v374_v42  ;;  %v438_v42 = vld [vmem:[%s1525_s24 + $0x950] sm:$0xff] }
 0x115   : > { %887 = vst [vmem:[%s1534_s25 + $0x758] sm:$0xff] %v375_v43  ;;  %v439_v43 = vld [vmem:[%s1525_s24 + $0x958] sm:$0xff] }
 0x116   : > { %888 = vst [vmem:[%s1534_s25 + $0x760] sm:$0xff] %v376_v44  ;;  %v440_v44 = vld [vmem:[%s1525_s24 + $0x960] sm:$0xff] }
 0x117   : > { %889 = vst [vmem:[%s1534_s25 + $0x768] sm:$0xff] %v377_v45  ;;  %v441_v45 = vld [vmem:[%s1525_s24 + $0x968] sm:$0xff] }
 0x118   : > { %890 = vst [vmem:[%s1534_s25 + $0x770] sm:$0xff] %v378_v46  ;;  %v442_v46 = vld [vmem:[%s1525_s24 + $0x970] sm:$0xff] }
 0x119   : > { %891 = vst [vmem:[%s1534_s25 + $0x778] sm:$0xff] %v379_v47  ;;  %v443_v47 = vld [vmem:[%s1525_s24 + $0x978] sm:$0xff] }
 0x11a   : > { %892 = vst [vmem:[%s1534_s25 + $0x780] sm:$0xff] %v380_v48  ;;  %v444_v48 = vld [vmem:[%s1525_s24 + $0x980] sm:$0xff] }
 0x11b   : > { %893 = vst [vmem:[%s1534_s25 + $0x788] sm:$0xff] %v381_v49  ;;  %v445_v49 = vld [vmem:[%s1525_s24 + $0x988] sm:$0xff] }
 0x11c   : > { %894 = vst [vmem:[%s1534_s25 + $0x790] sm:$0xff] %v382_v50  ;;  %v446_v50 = vld [vmem:[%s1525_s24 + $0x990] sm:$0xff] }
 0x11d   : > { %895 = vst [vmem:[%s1534_s25 + $0x798] sm:$0xff] %v383_v51  ;;  %v447_v51 = vld [vmem:[%s1525_s24 + $0x998] sm:$0xff] }
 0x11e   : > { %896 = vst [vmem:[%s1534_s25 + $0x7a0] sm:$0xff] %v384_v52  ;;  %v448_v52 = vld [vmem:[%s1525_s24 + $0x9a0] sm:$0xff] }
 0x11f   : > { %897 = vst [vmem:[%s1534_s25 + $0x7a8] sm:$0xff] %v385_v53  ;;  %v449_v53 = vld [vmem:[%s1525_s24 + $0x9a8] sm:$0xff] }
 0x120   : > { %898 = vst [vmem:[%s1534_s25 + $0x7b0] sm:$0xff] %v386_v54  ;;  %v450_v54 = vld [vmem:[%s1525_s24 + $0x9b0] sm:$0xff] }
 0x121   : > { %899 = vst [vmem:[%s1534_s25 + $0x7b8] sm:$0xff] %v387_v55  ;;  %v451_v55 = vld [vmem:[%s1525_s24 + $0x9b8] sm:$0xff] }
 0x122   : > { %900 = vst [vmem:[%s1534_s25 + $0x7c0] sm:$0xff] %v388_v56  ;;  %v452_v56 = vld [vmem:[%s1525_s24 + $0x9c0] sm:$0xff] }
 0x123   : > { %901 = vst [vmem:[%s1534_s25 + $0x7c8] sm:$0xff] %v389_v57  ;;  %v453_v57 = vld [vmem:[%s1525_s24 + $0x9c8] sm:$0xff] }
 0x124   : > { %902 = vst [vmem:[%s1534_s25 + $0x7d0] sm:$0xff] %v390_v58  ;;  %v454_v58 = vld [vmem:[%s1525_s24 + $0x9d0] sm:$0xff] }
 0x125   : > { %903 = vst [vmem:[%s1534_s25 + $0x7d8] sm:$0xff] %v391_v59  ;;  %v455_v59 = vld [vmem:[%s1525_s24 + $0x9d8] sm:$0xff] }
 0x126   : > { %904 = vst [vmem:[%s1534_s25 + $0x7e0] sm:$0xff] %v392_v60  ;;  %v456_v60 = vld [vmem:[%s1525_s24 + $0x9e0] sm:$0xff] }
 0x127   : > { %905 = vst [vmem:[%s1534_s25 + $0x7e8] sm:$0xff] %v393_v61  ;;  %v457_v61 = vld [vmem:[%s1525_s24 + $0x9e8] sm:$0xff] }
 0x128   : > { %906 = vst [vmem:[%s1534_s25 + $0x7f0] sm:$0xff] %v394_v62  ;;  %v458_v62 = vld [vmem:[%s1525_s24 + $0x9f0] sm:$0xff] }
 0x129   : > { %907 = vst [vmem:[%s1534_s25 + $0x7f8] sm:$0xff] %v395_v63  ;;  %v459_v63 = vld [vmem:[%s1525_s24 + $0x9f8] sm:$0xff] }
 0x12a   : > { %908 = vst [vmem:[%s1534_s25 + $0x800] sm:$0xff] %v396_v0  ;;  %v460_v0 = vld [vmem:[%s1525_s24 + $0xa00] sm:$0xff] }
 0x12b   : > { %909 = vst [vmem:[%s1534_s25 + $0x808] sm:$0xff] %v397_v1  ;;  %v461_v1 = vld [vmem:[%s1525_s24 + $0xa08] sm:$0xff] }
 0x12c   : > { %910 = vst [vmem:[%s1534_s25 + $0x810] sm:$0xff] %v398_v2  ;;  %v462_v2 = vld [vmem:[%s1525_s24 + $0xa10] sm:$0xff] }
 0x12d   : > { %911 = vst [vmem:[%s1534_s25 + $0x818] sm:$0xff] %v399_v3  ;;  %v463_v3 = vld [vmem:[%s1525_s24 + $0xa18] sm:$0xff] }
 0x12e   : > { %912 = vst [vmem:[%s1534_s25 + $0x820] sm:$0xff] %v400_v4  ;;  %v464_v4 = vld [vmem:[%s1525_s24 + $0xa20] sm:$0xff] }
 0x12f   : > { %913 = vst [vmem:[%s1534_s25 + $0x828] sm:$0xff] %v401_v5  ;;  %v465_v5 = vld [vmem:[%s1525_s24 + $0xa28] sm:$0xff] }
 0x130   : > { %914 = vst [vmem:[%s1534_s25 + $0x830] sm:$0xff] %v402_v6  ;;  %v466_v6 = vld [vmem:[%s1525_s24 + $0xa30] sm:$0xff] }
 0x131   : > { %915 = vst [vmem:[%s1534_s25 + $0x838] sm:$0xff] %v403_v7  ;;  %v467_v7 = vld [vmem:[%s1525_s24 + $0xa38] sm:$0xff] }
 0x132   : > { %916 = vst [vmem:[%s1534_s25 + $0x840] sm:$0xff] %v404_v8  ;;  %v468_v8 = vld [vmem:[%s1525_s24 + $0xa40] sm:$0xff] }
 0x133   : > { %917 = vst [vmem:[%s1534_s25 + $0x848] sm:$0xff] %v405_v9  ;;  %v469_v9 = vld [vmem:[%s1525_s24 + $0xa48] sm:$0xff] }
 0x134   : > { %918 = vst [vmem:[%s1534_s25 + $0x850] sm:$0xff] %v406_v10  ;;  %v470_v10 = vld [vmem:[%s1525_s24 + $0xa50] sm:$0xff] }
 0x135   : > { %919 = vst [vmem:[%s1534_s25 + $0x858] sm:$0xff] %v407_v11  ;;  %v471_v11 = vld [vmem:[%s1525_s24 + $0xa58] sm:$0xff] }
 0x136   : > { %920 = vst [vmem:[%s1534_s25 + $0x860] sm:$0xff] %v408_v12  ;;  %v472_v12 = vld [vmem:[%s1525_s24 + $0xa60] sm:$0xff] }
 0x137   : > { %921 = vst [vmem:[%s1534_s25 + $0x868] sm:$0xff] %v409_v13  ;;  %v473_v13 = vld [vmem:[%s1525_s24 + $0xa68] sm:$0xff] }
 0x138   : > { %922 = vst [vmem:[%s1534_s25 + $0x870] sm:$0xff] %v410_v14  ;;  %v474_v14 = vld [vmem:[%s1525_s24 + $0xa70] sm:$0xff] }
 0x139   : > { %923 = vst [vmem:[%s1534_s25 + $0x878] sm:$0xff] %v411_v15  ;;  %v475_v15 = vld [vmem:[%s1525_s24 + $0xa78] sm:$0xff] }
 0x13a   : > { %924 = vst [vmem:[%s1534_s25 + $0x880] sm:$0xff] %v412_v16  ;;  %v476_v16 = vld [vmem:[%s1525_s24 + $0xa80] sm:$0xff] }
 0x13b   : > { %925 = vst [vmem:[%s1534_s25 + $0x888] sm:$0xff] %v413_v17  ;;  %v477_v17 = vld [vmem:[%s1525_s24 + $0xa88] sm:$0xff] }
 0x13c   : > { %926 = vst [vmem:[%s1534_s25 + $0x890] sm:$0xff] %v414_v18  ;;  %v478_v18 = vld [vmem:[%s1525_s24 + $0xa90] sm:$0xff] }
 0x13d   : > { %927 = vst [vmem:[%s1534_s25 + $0x898] sm:$0xff] %v415_v19  ;;  %v479_v19 = vld [vmem:[%s1525_s24 + $0xa98] sm:$0xff] }
 0x13e   : > { %928 = vst [vmem:[%s1534_s25 + $0x8a0] sm:$0xff] %v416_v20  ;;  %v480_v20 = vld [vmem:[%s1525_s24 + $0xaa0] sm:$0xff] }
 0x13f   : > { %929 = vst [vmem:[%s1534_s25 + $0x8a8] sm:$0xff] %v417_v21  ;;  %v481_v21 = vld [vmem:[%s1525_s24 + $0xaa8] sm:$0xff] }
 0x140   : > { %930 = vst [vmem:[%s1534_s25 + $0x8b0] sm:$0xff] %v418_v22  ;;  %v482_v22 = vld [vmem:[%s1525_s24 + $0xab0] sm:$0xff] }
 0x141   : > { %931 = vst [vmem:[%s1534_s25 + $0x8b8] sm:$0xff] %v419_v23  ;;  %v483_v23 = vld [vmem:[%s1525_s24 + $0xab8] sm:$0xff] }
 0x142   : > { %932 = vst [vmem:[%s1534_s25 + $0x8c0] sm:$0xff] %v420_v24  ;;  %v484_v24 = vld [vmem:[%s1525_s24 + $0xac0] sm:$0xff] }
 0x143   : > { %933 = vst [vmem:[%s1534_s25 + $0x8c8] sm:$0xff] %v421_v25  ;;  %v485_v25 = vld [vmem:[%s1525_s24 + $0xac8] sm:$0xff] }
 0x144   : > { %934 = vst [vmem:[%s1534_s25 + $0x8d0] sm:$0xff] %v422_v26  ;;  %v486_v26 = vld [vmem:[%s1525_s24 + $0xad0] sm:$0xff] }
 0x145   : > { %935 = vst [vmem:[%s1534_s25 + $0x8d8] sm:$0xff] %v423_v27  ;;  %v487_v27 = vld [vmem:[%s1525_s24 + $0xad8] sm:$0xff] }
 0x146   : > { %936 = vst [vmem:[%s1534_s25 + $0x8e0] sm:$0xff] %v424_v28  ;;  %v488_v28 = vld [vmem:[%s1525_s24 + $0xae0] sm:$0xff] }
 0x147   : > { %937 = vst [vmem:[%s1534_s25 + $0x8e8] sm:$0xff] %v425_v29  ;;  %v489_v29 = vld [vmem:[%s1525_s24 + $0xae8] sm:$0xff] }
 0x148   : > { %938 = vst [vmem:[%s1534_s25 + $0x8f0] sm:$0xff] %v426_v30  ;;  %v490_v30 = vld [vmem:[%s1525_s24 + $0xaf0] sm:$0xff] }
 0x149   : > { %939 = vst [vmem:[%s1534_s25 + $0x8f8] sm:$0xff] %v427_v31  ;;  %v491_v31 = vld [vmem:[%s1525_s24 + $0xaf8] sm:$0xff] }
 0x14a   : > { %940 = vst [vmem:[%s1534_s25 + $0x900] sm:$0xff] %v428_v32  ;;  %v492_v32 = vld [vmem:[%s1525_s24 + $0xb00] sm:$0xff] }
 0x14b   : > { %941 = vst [vmem:[%s1534_s25 + $0x908] sm:$0xff] %v429_v33  ;;  %v493_v33 = vld [vmem:[%s1525_s24 + $0xb08] sm:$0xff] }
 0x14c   : > { %942 = vst [vmem:[%s1534_s25 + $0x910] sm:$0xff] %v430_v34  ;;  %v494_v34 = vld [vmem:[%s1525_s24 + $0xb10] sm:$0xff] }
 0x14d   : > { %943 = vst [vmem:[%s1534_s25 + $0x918] sm:$0xff] %v431_v35  ;;  %v495_v35 = vld [vmem:[%s1525_s24 + $0xb18] sm:$0xff] }
 0x14e   : > { %944 = vst [vmem:[%s1534_s25 + $0x920] sm:$0xff] %v432_v36  ;;  %v496_v36 = vld [vmem:[%s1525_s24 + $0xb20] sm:$0xff] }
 0x14f   : > { %945 = vst [vmem:[%s1534_s25 + $0x928] sm:$0xff] %v433_v37  ;;  %v497_v37 = vld [vmem:[%s1525_s24 + $0xb28] sm:$0xff] }
 0x150   : > { %946 = vst [vmem:[%s1534_s25 + $0x930] sm:$0xff] %v434_v38  ;;  %v498_v38 = vld [vmem:[%s1525_s24 + $0xb30] sm:$0xff] }
 0x151   : > { %947 = vst [vmem:[%s1534_s25 + $0x938] sm:$0xff] %v435_v39  ;;  %v499_v39 = vld [vmem:[%s1525_s24 + $0xb38] sm:$0xff] }
 0x152   : > { %948 = vst [vmem:[%s1534_s25 + $0x940] sm:$0xff] %v436_v40  ;;  %v500_v40 = vld [vmem:[%s1525_s24 + $0xb40] sm:$0xff] }
 0x153   : > { %949 = vst [vmem:[%s1534_s25 + $0x948] sm:$0xff] %v437_v41  ;;  %v501_v41 = vld [vmem:[%s1525_s24 + $0xb48] sm:$0xff] }
 0x154   : > { %950 = vst [vmem:[%s1534_s25 + $0x950] sm:$0xff] %v438_v42  ;;  %v502_v42 = vld [vmem:[%s1525_s24 + $0xb50] sm:$0xff] }
 0x155   : > { %951 = vst [vmem:[%s1534_s25 + $0x958] sm:$0xff] %v439_v43  ;;  %v503_v43 = vld [vmem:[%s1525_s24 + $0xb58] sm:$0xff] }
 0x156   : > { %952 = vst [vmem:[%s1534_s25 + $0x960] sm:$0xff] %v440_v44  ;;  %v504_v44 = vld [vmem:[%s1525_s24 + $0xb60] sm:$0xff] }
 0x157   : > { %953 = vst [vmem:[%s1534_s25 + $0x968] sm:$0xff] %v441_v45  ;;  %v505_v45 = vld [vmem:[%s1525_s24 + $0xb68] sm:$0xff] }
 0x158   : > { %954 = vst [vmem:[%s1534_s25 + $0x970] sm:$0xff] %v442_v46  ;;  %v506_v46 = vld [vmem:[%s1525_s24 + $0xb70] sm:$0xff] }
 0x159   : > { %955 = vst [vmem:[%s1534_s25 + $0x978] sm:$0xff] %v443_v47  ;;  %v507_v47 = vld [vmem:[%s1525_s24 + $0xb78] sm:$0xff] }
 0x15a   : > { %956 = vst [vmem:[%s1534_s25 + $0x980] sm:$0xff] %v444_v48  ;;  %v508_v48 = vld [vmem:[%s1525_s24 + $0xb80] sm:$0xff] }
 0x15b   : > { %957 = vst [vmem:[%s1534_s25 + $0x988] sm:$0xff] %v445_v49  ;;  %v509_v49 = vld [vmem:[%s1525_s24 + $0xb88] sm:$0xff] }
 0x15c   : > { %958 = vst [vmem:[%s1534_s25 + $0x990] sm:$0xff] %v446_v50  ;;  %v510_v50 = vld [vmem:[%s1525_s24 + $0xb90] sm:$0xff] }
 0x15d   : > { %959 = vst [vmem:[%s1534_s25 + $0x998] sm:$0xff] %v447_v51  ;;  %v511_v51 = vld [vmem:[%s1525_s24 + $0xb98] sm:$0xff] }
 0x15e   : > { %960 = vst [vmem:[%s1534_s25 + $0x9a0] sm:$0xff] %v448_v52  ;;  %v512_v52 = vld [vmem:[%s1525_s24 + $0xba0] sm:$0xff] }
 0x15f   : > { %961 = vst [vmem:[%s1534_s25 + $0x9a8] sm:$0xff] %v449_v53  ;;  %v513_v53 = vld [vmem:[%s1525_s24 + $0xba8] sm:$0xff] }
 0x160   : > { %962 = vst [vmem:[%s1534_s25 + $0x9b0] sm:$0xff] %v450_v54  ;;  %v514_v54 = vld [vmem:[%s1525_s24 + $0xbb0] sm:$0xff] }
 0x161   : > { %963 = vst [vmem:[%s1534_s25 + $0x9b8] sm:$0xff] %v451_v55  ;;  %v515_v55 = vld [vmem:[%s1525_s24 + $0xbb8] sm:$0xff] }
 0x162   : > { %964 = vst [vmem:[%s1534_s25 + $0x9c0] sm:$0xff] %v452_v56  ;;  %v516_v56 = vld [vmem:[%s1525_s24 + $0xbc0] sm:$0xff] }
 0x163   : > { %965 = vst [vmem:[%s1534_s25 + $0x9c8] sm:$0xff] %v453_v57  ;;  %v517_v57 = vld [vmem:[%s1525_s24 + $0xbc8] sm:$0xff] }
 0x164   : > { %966 = vst [vmem:[%s1534_s25 + $0x9d0] sm:$0xff] %v454_v58  ;;  %v518_v58 = vld [vmem:[%s1525_s24 + $0xbd0] sm:$0xff] }
 0x165   : > { %967 = vst [vmem:[%s1534_s25 + $0x9d8] sm:$0xff] %v455_v59  ;;  %v519_v59 = vld [vmem:[%s1525_s24 + $0xbd8] sm:$0xff] }
 0x166   : > { %968 = vst [vmem:[%s1534_s25 + $0x9e0] sm:$0xff] %v456_v60  ;;  %v520_v60 = vld [vmem:[%s1525_s24 + $0xbe0] sm:$0xff] }
 0x167   : > { %969 = vst [vmem:[%s1534_s25 + $0x9e8] sm:$0xff] %v457_v61  ;;  %v521_v61 = vld [vmem:[%s1525_s24 + $0xbe8] sm:$0xff] }
 0x168   : > { %970 = vst [vmem:[%s1534_s25 + $0x9f0] sm:$0xff] %v458_v62  ;;  %v522_v62 = vld [vmem:[%s1525_s24 + $0xbf0] sm:$0xff] }
 0x169   : > { %971 = vst [vmem:[%s1534_s25 + $0x9f8] sm:$0xff] %v459_v63  ;;  %v523_v63 = vld [vmem:[%s1525_s24 + $0xbf8] sm:$0xff] }
 0x16a   : > { %972 = vst [vmem:[%s1534_s25 + $0xa00] sm:$0xff] %v460_v0  ;;  %v524_v0 = vld [vmem:[%s1525_s24 + $0xc00] sm:$0xff] }
 0x16b   : > { %973 = vst [vmem:[%s1534_s25 + $0xa08] sm:$0xff] %v461_v1  ;;  %v525_v1 = vld [vmem:[%s1525_s24 + $0xc08] sm:$0xff] }
 0x16c   : > { %974 = vst [vmem:[%s1534_s25 + $0xa10] sm:$0xff] %v462_v2  ;;  %v526_v2 = vld [vmem:[%s1525_s24 + $0xc10] sm:$0xff] }
 0x16d   : > { %975 = vst [vmem:[%s1534_s25 + $0xa18] sm:$0xff] %v463_v3  ;;  %v527_v3 = vld [vmem:[%s1525_s24 + $0xc18] sm:$0xff] }
 0x16e   : > { %976 = vst [vmem:[%s1534_s25 + $0xa20] sm:$0xff] %v464_v4  ;;  %v528_v4 = vld [vmem:[%s1525_s24 + $0xc20] sm:$0xff] }
 0x16f   : > { %977 = vst [vmem:[%s1534_s25 + $0xa28] sm:$0xff] %v465_v5  ;;  %v529_v5 = vld [vmem:[%s1525_s24 + $0xc28] sm:$0xff] }
 0x170   : > { %978 = vst [vmem:[%s1534_s25 + $0xa30] sm:$0xff] %v466_v6  ;;  %v530_v6 = vld [vmem:[%s1525_s24 + $0xc30] sm:$0xff] }
 0x171   : > { %979 = vst [vmem:[%s1534_s25 + $0xa38] sm:$0xff] %v467_v7  ;;  %v531_v7 = vld [vmem:[%s1525_s24 + $0xc38] sm:$0xff] }
 0x172   : > { %980 = vst [vmem:[%s1534_s25 + $0xa40] sm:$0xff] %v468_v8  ;;  %v532_v8 = vld [vmem:[%s1525_s24 + $0xc40] sm:$0xff] }
 0x173   : > { %981 = vst [vmem:[%s1534_s25 + $0xa48] sm:$0xff] %v469_v9  ;;  %v533_v9 = vld [vmem:[%s1525_s24 + $0xc48] sm:$0xff] }
 0x174   : > { %982 = vst [vmem:[%s1534_s25 + $0xa50] sm:$0xff] %v470_v10  ;;  %v534_v10 = vld [vmem:[%s1525_s24 + $0xc50] sm:$0xff] }
 0x175   : > { %983 = vst [vmem:[%s1534_s25 + $0xa58] sm:$0xff] %v471_v11  ;;  %v535_v11 = vld [vmem:[%s1525_s24 + $0xc58] sm:$0xff] }
 0x176   : > { %984 = vst [vmem:[%s1534_s25 + $0xa60] sm:$0xff] %v472_v12  ;;  %v536_v12 = vld [vmem:[%s1525_s24 + $0xc60] sm:$0xff] }
 0x177   : > { %985 = vst [vmem:[%s1534_s25 + $0xa68] sm:$0xff] %v473_v13  ;;  %v537_v13 = vld [vmem:[%s1525_s24 + $0xc68] sm:$0xff] }
 0x178   : > { %986 = vst [vmem:[%s1534_s25 + $0xa70] sm:$0xff] %v474_v14  ;;  %v538_v14 = vld [vmem:[%s1525_s24 + $0xc70] sm:$0xff] }
 0x179   : > { %987 = vst [vmem:[%s1534_s25 + $0xa78] sm:$0xff] %v475_v15  ;;  %v539_v15 = vld [vmem:[%s1525_s24 + $0xc78] sm:$0xff] }
 0x17a   : > { %988 = vst [vmem:[%s1534_s25 + $0xa80] sm:$0xff] %v476_v16  ;;  %v540_v16 = vld [vmem:[%s1525_s24 + $0xc80] sm:$0xff] }
 0x17b   : > { %989 = vst [vmem:[%s1534_s25 + $0xa88] sm:$0xff] %v477_v17  ;;  %v541_v17 = vld [vmem:[%s1525_s24 + $0xc88] sm:$0xff] }
 0x17c   : > { %990 = vst [vmem:[%s1534_s25 + $0xa90] sm:$0xff] %v478_v18  ;;  %v542_v18 = vld [vmem:[%s1525_s24 + $0xc90] sm:$0xff] }
 0x17d   : > { %991 = vst [vmem:[%s1534_s25 + $0xa98] sm:$0xff] %v479_v19  ;;  %v543_v19 = vld [vmem:[%s1525_s24 + $0xc98] sm:$0xff] }
 0x17e   : > { %992 = vst [vmem:[%s1534_s25 + $0xaa0] sm:$0xff] %v480_v20  ;;  %v544_v20 = vld [vmem:[%s1525_s24 + $0xca0] sm:$0xff] }
 0x17f   : > { %993 = vst [vmem:[%s1534_s25 + $0xaa8] sm:$0xff] %v481_v21  ;;  %v545_v21 = vld [vmem:[%s1525_s24 + $0xca8] sm:$0xff] }
 0x180   : > { %994 = vst [vmem:[%s1534_s25 + $0xab0] sm:$0xff] %v482_v22  ;;  %v546_v22 = vld [vmem:[%s1525_s24 + $0xcb0] sm:$0xff] }
 0x181   : > { %995 = vst [vmem:[%s1534_s25 + $0xab8] sm:$0xff] %v483_v23  ;;  %v547_v23 = vld [vmem:[%s1525_s24 + $0xcb8] sm:$0xff] }
 0x182   : > { %996 = vst [vmem:[%s1534_s25 + $0xac0] sm:$0xff] %v484_v24  ;;  %v548_v24 = vld [vmem:[%s1525_s24 + $0xcc0] sm:$0xff] }
 0x183   : > { %997 = vst [vmem:[%s1534_s25 + $0xac8] sm:$0xff] %v485_v25  ;;  %v549_v25 = vld [vmem:[%s1525_s24 + $0xcc8] sm:$0xff] }
 0x184   : > { %998 = vst [vmem:[%s1534_s25 + $0xad0] sm:$0xff] %v486_v26  ;;  %v550_v26 = vld [vmem:[%s1525_s24 + $0xcd0] sm:$0xff] }
 0x185   : > { %999 = vst [vmem:[%s1534_s25 + $0xad8] sm:$0xff] %v487_v27  ;;  %v551_v27 = vld [vmem:[%s1525_s24 + $0xcd8] sm:$0xff] }
 0x186   : > { %1000 = vst [vmem:[%s1534_s25 + $0xae0] sm:$0xff] %v488_v28  ;;  %v552_v28 = vld [vmem:[%s1525_s24 + $0xce0] sm:$0xff] }
 0x187   : > { %1001 = vst [vmem:[%s1534_s25 + $0xae8] sm:$0xff] %v489_v29  ;;  %v553_v29 = vld [vmem:[%s1525_s24 + $0xce8] sm:$0xff] }
 0x188   : > { %1002 = vst [vmem:[%s1534_s25 + $0xaf0] sm:$0xff] %v490_v30  ;;  %v554_v30 = vld [vmem:[%s1525_s24 + $0xcf0] sm:$0xff] }
 0x189   : > { %1003 = vst [vmem:[%s1534_s25 + $0xaf8] sm:$0xff] %v491_v31  ;;  %v555_v31 = vld [vmem:[%s1525_s24 + $0xcf8] sm:$0xff] }
 0x18a   : > { %1004 = vst [vmem:[%s1534_s25 + $0xb00] sm:$0xff] %v492_v32  ;;  %v556_v32 = vld [vmem:[%s1525_s24 + $0xd00] sm:$0xff] }
 0x18b   : > { %1005 = vst [vmem:[%s1534_s25 + $0xb08] sm:$0xff] %v493_v33  ;;  %v557_v33 = vld [vmem:[%s1525_s24 + $0xd08] sm:$0xff] }
 0x18c   : > { %1006 = vst [vmem:[%s1534_s25 + $0xb10] sm:$0xff] %v494_v34  ;;  %v558_v34 = vld [vmem:[%s1525_s24 + $0xd10] sm:$0xff] }
 0x18d   : > { %1007 = vst [vmem:[%s1534_s25 + $0xb18] sm:$0xff] %v495_v35  ;;  %v559_v35 = vld [vmem:[%s1525_s24 + $0xd18] sm:$0xff] }
 0x18e   : > { %1008 = vst [vmem:[%s1534_s25 + $0xb20] sm:$0xff] %v496_v36  ;;  %v560_v36 = vld [vmem:[%s1525_s24 + $0xd20] sm:$0xff] }
 0x18f   : > { %1009 = vst [vmem:[%s1534_s25 + $0xb28] sm:$0xff] %v497_v37  ;;  %v561_v37 = vld [vmem:[%s1525_s24 + $0xd28] sm:$0xff] }
 0x190   : > { %1010 = vst [vmem:[%s1534_s25 + $0xb30] sm:$0xff] %v498_v38  ;;  %v562_v38 = vld [vmem:[%s1525_s24 + $0xd30] sm:$0xff] }
 0x191   : > { %1011 = vst [vmem:[%s1534_s25 + $0xb38] sm:$0xff] %v499_v39  ;;  %v563_v39 = vld [vmem:[%s1525_s24 + $0xd38] sm:$0xff] }
 0x192   : > { %1012 = vst [vmem:[%s1534_s25 + $0xb40] sm:$0xff] %v500_v40  ;;  %v564_v40 = vld [vmem:[%s1525_s24 + $0xd40] sm:$0xff] }
 0x193   : > { %1013 = vst [vmem:[%s1534_s25 + $0xb48] sm:$0xff] %v501_v41  ;;  %v565_v41 = vld [vmem:[%s1525_s24 + $0xd48] sm:$0xff] }
 0x194   : > { %1014 = vst [vmem:[%s1534_s25 + $0xb50] sm:$0xff] %v502_v42  ;;  %v566_v42 = vld [vmem:[%s1525_s24 + $0xd50] sm:$0xff] }
 0x195   : > { %1015 = vst [vmem:[%s1534_s25 + $0xb58] sm:$0xff] %v503_v43  ;;  %v567_v43 = vld [vmem:[%s1525_s24 + $0xd58] sm:$0xff] }
 0x196   : > { %1016 = vst [vmem:[%s1534_s25 + $0xb60] sm:$0xff] %v504_v44  ;;  %v568_v44 = vld [vmem:[%s1525_s24 + $0xd60] sm:$0xff] }
 0x197   : > { %1017 = vst [vmem:[%s1534_s25 + $0xb68] sm:$0xff] %v505_v45  ;;  %v569_v45 = vld [vmem:[%s1525_s24 + $0xd68] sm:$0xff] }
 0x198   : > { %1018 = vst [vmem:[%s1534_s25 + $0xb70] sm:$0xff] %v506_v46  ;;  %v570_v46 = vld [vmem:[%s1525_s24 + $0xd70] sm:$0xff] }
 0x199   : > { %1019 = vst [vmem:[%s1534_s25 + $0xb78] sm:$0xff] %v507_v47  ;;  %v571_v47 = vld [vmem:[%s1525_s24 + $0xd78] sm:$0xff] }
 0x19a   : > { %1020 = vst [vmem:[%s1534_s25 + $0xb80] sm:$0xff] %v508_v48  ;;  %v572_v48 = vld [vmem:[%s1525_s24 + $0xd80] sm:$0xff] }
 0x19b   : > { %1021 = vst [vmem:[%s1534_s25 + $0xb88] sm:$0xff] %v509_v49  ;;  %v573_v49 = vld [vmem:[%s1525_s24 + $0xd88] sm:$0xff] }
 0x19c   : > { %1022 = vst [vmem:[%s1534_s25 + $0xb90] sm:$0xff] %v510_v50  ;;  %v574_v50 = vld [vmem:[%s1525_s24 + $0xd90] sm:$0xff] }
 0x19d   : > { %1023 = vst [vmem:[%s1534_s25 + $0xb98] sm:$0xff] %v511_v51  ;;  %v575_v51 = vld [vmem:[%s1525_s24 + $0xd98] sm:$0xff] }
 0x19e   : > { %1024 = vst [vmem:[%s1534_s25 + $0xba0] sm:$0xff] %v512_v52  ;;  %v576_v52 = vld [vmem:[%s1525_s24 + $0xda0] sm:$0xff] }
 0x19f   : > { %1025 = vst [vmem:[%s1534_s25 + $0xba8] sm:$0xff] %v513_v53  ;;  %v577_v53 = vld [vmem:[%s1525_s24 + $0xda8] sm:$0xff] }
 0x1a0   : > { %1026 = vst [vmem:[%s1534_s25 + $0xbb0] sm:$0xff] %v514_v54  ;;  %v578_v54 = vld [vmem:[%s1525_s24 + $0xdb0] sm:$0xff] }
 0x1a1   : > { %1027 = vst [vmem:[%s1534_s25 + $0xbb8] sm:$0xff] %v515_v55  ;;  %v579_v55 = vld [vmem:[%s1525_s24 + $0xdb8] sm:$0xff] }
 0x1a2   : > { %1028 = vst [vmem:[%s1534_s25 + $0xbc0] sm:$0xff] %v516_v56  ;;  %v580_v56 = vld [vmem:[%s1525_s24 + $0xdc0] sm:$0xff] }
 0x1a3   : > { %1029 = vst [vmem:[%s1534_s25 + $0xbc8] sm:$0xff] %v517_v57  ;;  %v581_v57 = vld [vmem:[%s1525_s24 + $0xdc8] sm:$0xff] }
 0x1a4   : > { %1030 = vst [vmem:[%s1534_s25 + $0xbd0] sm:$0xff] %v518_v58  ;;  %v582_v58 = vld [vmem:[%s1525_s24 + $0xdd0] sm:$0xff] }
 0x1a5   : > { %1031 = vst [vmem:[%s1534_s25 + $0xbd8] sm:$0xff] %v519_v59  ;;  %v583_v59 = vld [vmem:[%s1525_s24 + $0xdd8] sm:$0xff] }
 0x1a6   : > { %1032 = vst [vmem:[%s1534_s25 + $0xbe0] sm:$0xff] %v520_v60  ;;  %v584_v60 = vld [vmem:[%s1525_s24 + $0xde0] sm:$0xff] }
 0x1a7   : > { %1033 = vst [vmem:[%s1534_s25 + $0xbe8] sm:$0xff] %v521_v61  ;;  %v585_v61 = vld [vmem:[%s1525_s24 + $0xde8] sm:$0xff] }
 0x1a8   : > { %1034 = vst [vmem:[%s1534_s25 + $0xbf0] sm:$0xff] %v522_v62  ;;  %v586_v62 = vld [vmem:[%s1525_s24 + $0xdf0] sm:$0xff] }
 0x1a9   : > { %1035 = vst [vmem:[%s1534_s25 + $0xbf8] sm:$0xff] %v523_v63  ;;  %v587_v63 = vld [vmem:[%s1525_s24 + $0xdf8] sm:$0xff] }
 0x1aa   : > { %1036 = vst [vmem:[%s1534_s25 + $0xc00] sm:$0xff] %v524_v0  ;;  %v588_v0 = vld [vmem:[%s1525_s24 + $0xe00] sm:$0xff] }
 0x1ab   : > { %1037 = vst [vmem:[%s1534_s25 + $0xc08] sm:$0xff] %v525_v1  ;;  %v589_v1 = vld [vmem:[%s1525_s24 + $0xe08] sm:$0xff] }
 0x1ac   : > { %1038 = vst [vmem:[%s1534_s25 + $0xc10] sm:$0xff] %v526_v2  ;;  %v590_v2 = vld [vmem:[%s1525_s24 + $0xe10] sm:$0xff] }
 0x1ad   : > { %1039 = vst [vmem:[%s1534_s25 + $0xc18] sm:$0xff] %v527_v3  ;;  %v591_v3 = vld [vmem:[%s1525_s24 + $0xe18] sm:$0xff] }
 0x1ae   : > { %1040 = vst [vmem:[%s1534_s25 + $0xc20] sm:$0xff] %v528_v4  ;;  %v592_v4 = vld [vmem:[%s1525_s24 + $0xe20] sm:$0xff] }
 0x1af   : > { %1041 = vst [vmem:[%s1534_s25 + $0xc28] sm:$0xff] %v529_v5  ;;  %v593_v5 = vld [vmem:[%s1525_s24 + $0xe28] sm:$0xff] }
 0x1b0   : > { %1042 = vst [vmem:[%s1534_s25 + $0xc30] sm:$0xff] %v530_v6  ;;  %v594_v6 = vld [vmem:[%s1525_s24 + $0xe30] sm:$0xff] }
 0x1b1   : > { %1043 = vst [vmem:[%s1534_s25 + $0xc38] sm:$0xff] %v531_v7  ;;  %v595_v7 = vld [vmem:[%s1525_s24 + $0xe38] sm:$0xff] }
 0x1b2   : > { %1044 = vst [vmem:[%s1534_s25 + $0xc40] sm:$0xff] %v532_v8  ;;  %v596_v8 = vld [vmem:[%s1525_s24 + $0xe40] sm:$0xff] }
 0x1b3   : > { %1045 = vst [vmem:[%s1534_s25 + $0xc48] sm:$0xff] %v533_v9  ;;  %v597_v9 = vld [vmem:[%s1525_s24 + $0xe48] sm:$0xff] }
 0x1b4   : > { %1046 = vst [vmem:[%s1534_s25 + $0xc50] sm:$0xff] %v534_v10  ;;  %v598_v10 = vld [vmem:[%s1525_s24 + $0xe50] sm:$0xff] }
 0x1b5   : > { %1047 = vst [vmem:[%s1534_s25 + $0xc58] sm:$0xff] %v535_v11  ;;  %v599_v11 = vld [vmem:[%s1525_s24 + $0xe58] sm:$0xff] }
 0x1b6   : > { %1048 = vst [vmem:[%s1534_s25 + $0xc60] sm:$0xff] %v536_v12  ;;  %v600_v12 = vld [vmem:[%s1525_s24 + $0xe60] sm:$0xff] }
 0x1b7   : > { %1049 = vst [vmem:[%s1534_s25 + $0xc68] sm:$0xff] %v537_v13  ;;  %v601_v13 = vld [vmem:[%s1525_s24 + $0xe68] sm:$0xff] }
 0x1b8   : > { %1050 = vst [vmem:[%s1534_s25 + $0xc70] sm:$0xff] %v538_v14  ;;  %v602_v14 = vld [vmem:[%s1525_s24 + $0xe70] sm:$0xff] }
 0x1b9   : > { %1051 = vst [vmem:[%s1534_s25 + $0xc78] sm:$0xff] %v539_v15  ;;  %v603_v15 = vld [vmem:[%s1525_s24 + $0xe78] sm:$0xff] }
 0x1ba   : > { %1052 = vst [vmem:[%s1534_s25 + $0xc80] sm:$0xff] %v540_v16  ;;  %v604_v16 = vld [vmem:[%s1525_s24 + $0xe80] sm:$0xff] }
 0x1bb   : > { %1053 = vst [vmem:[%s1534_s25 + $0xc88] sm:$0xff] %v541_v17  ;;  %v605_v17 = vld [vmem:[%s1525_s24 + $0xe88] sm:$0xff] }
 0x1bc   : > { %1054 = vst [vmem:[%s1534_s25 + $0xc90] sm:$0xff] %v542_v18  ;;  %v606_v18 = vld [vmem:[%s1525_s24 + $0xe90] sm:$0xff] }
 0x1bd   : > { %1055 = vst [vmem:[%s1534_s25 + $0xc98] sm:$0xff] %v543_v19  ;;  %v607_v19 = vld [vmem:[%s1525_s24 + $0xe98] sm:$0xff] }
 0x1be   : > { %1056 = vst [vmem:[%s1534_s25 + $0xca0] sm:$0xff] %v544_v20  ;;  %v608_v20 = vld [vmem:[%s1525_s24 + $0xea0] sm:$0xff] }
 0x1bf   : > { %1057 = vst [vmem:[%s1534_s25 + $0xca8] sm:$0xff] %v545_v21  ;;  %v609_v21 = vld [vmem:[%s1525_s24 + $0xea8] sm:$0xff] }
 0x1c0   : > { %1058 = vst [vmem:[%s1534_s25 + $0xcb0] sm:$0xff] %v546_v22  ;;  %v610_v22 = vld [vmem:[%s1525_s24 + $0xeb0] sm:$0xff] }
 0x1c1   : > { %1059 = vst [vmem:[%s1534_s25 + $0xcb8] sm:$0xff] %v547_v23  ;;  %v611_v23 = vld [vmem:[%s1525_s24 + $0xeb8] sm:$0xff] }
 0x1c2   : > { %1060 = vst [vmem:[%s1534_s25 + $0xcc0] sm:$0xff] %v548_v24  ;;  %v612_v24 = vld [vmem:[%s1525_s24 + $0xec0] sm:$0xff] }
 0x1c3   : > { %1061 = vst [vmem:[%s1534_s25 + $0xcc8] sm:$0xff] %v549_v25  ;;  %v613_v25 = vld [vmem:[%s1525_s24 + $0xec8] sm:$0xff] }
 0x1c4   : > { %1062 = vst [vmem:[%s1534_s25 + $0xcd0] sm:$0xff] %v550_v26  ;;  %v614_v26 = vld [vmem:[%s1525_s24 + $0xed0] sm:$0xff] }
 0x1c5   : > { %1063 = vst [vmem:[%s1534_s25 + $0xcd8] sm:$0xff] %v551_v27  ;;  %v615_v27 = vld [vmem:[%s1525_s24 + $0xed8] sm:$0xff] }
 0x1c6   : > { %1064 = vst [vmem:[%s1534_s25 + $0xce0] sm:$0xff] %v552_v28  ;;  %v616_v28 = vld [vmem:[%s1525_s24 + $0xee0] sm:$0xff] }
 0x1c7   : > { %1065 = vst [vmem:[%s1534_s25 + $0xce8] sm:$0xff] %v553_v29  ;;  %v617_v29 = vld [vmem:[%s1525_s24 + $0xee8] sm:$0xff] }
 0x1c8   : > { %1066 = vst [vmem:[%s1534_s25 + $0xcf0] sm:$0xff] %v554_v30  ;;  %v618_v30 = vld [vmem:[%s1525_s24 + $0xef0] sm:$0xff] }
 0x1c9   : > { %1067 = vst [vmem:[%s1534_s25 + $0xcf8] sm:$0xff] %v555_v31  ;;  %v619_v31 = vld [vmem:[%s1525_s24 + $0xef8] sm:$0xff] }
 0x1ca   : > { %1068 = vst [vmem:[%s1534_s25 + $0xd00] sm:$0xff] %v556_v32  ;;  %v620_v32 = vld [vmem:[%s1525_s24 + $0xf00] sm:$0xff] }
 0x1cb   : > { %1069 = vst [vmem:[%s1534_s25 + $0xd08] sm:$0xff] %v557_v33  ;;  %v621_v33 = vld [vmem:[%s1525_s24 + $0xf08] sm:$0xff] }
 0x1cc   : > { %1070 = vst [vmem:[%s1534_s25 + $0xd10] sm:$0xff] %v558_v34  ;;  %v622_v34 = vld [vmem:[%s1525_s24 + $0xf10] sm:$0xff] }
 0x1cd   : > { %1071 = vst [vmem:[%s1534_s25 + $0xd18] sm:$0xff] %v559_v35  ;;  %v623_v35 = vld [vmem:[%s1525_s24 + $0xf18] sm:$0xff] }
 0x1ce   : > { %1072 = vst [vmem:[%s1534_s25 + $0xd20] sm:$0xff] %v560_v36  ;;  %v624_v36 = vld [vmem:[%s1525_s24 + $0xf20] sm:$0xff] }
 0x1cf   : > { %1073 = vst [vmem:[%s1534_s25 + $0xd28] sm:$0xff] %v561_v37  ;;  %v625_v37 = vld [vmem:[%s1525_s24 + $0xf28] sm:$0xff] }
 0x1d0   : > { %1074 = vst [vmem:[%s1534_s25 + $0xd30] sm:$0xff] %v562_v38  ;;  %v626_v38 = vld [vmem:[%s1525_s24 + $0xf30] sm:$0xff] }
 0x1d1   : > { %1075 = vst [vmem:[%s1534_s25 + $0xd38] sm:$0xff] %v563_v39  ;;  %v627_v39 = vld [vmem:[%s1525_s24 + $0xf38] sm:$0xff] }
 0x1d2   : > { %1076 = vst [vmem:[%s1534_s25 + $0xd40] sm:$0xff] %v564_v40  ;;  %v628_v40 = vld [vmem:[%s1525_s24 + $0xf40] sm:$0xff] }
 0x1d3   : > { %1077 = vst [vmem:[%s1534_s25 + $0xd48] sm:$0xff] %v565_v41  ;;  %v629_v41 = vld [vmem:[%s1525_s24 + $0xf48] sm:$0xff] }
 0x1d4   : > { %1078 = vst [vmem:[%s1534_s25 + $0xd50] sm:$0xff] %v566_v42  ;;  %v630_v42 = vld [vmem:[%s1525_s24 + $0xf50] sm:$0xff] }
 0x1d5   : > { %1079 = vst [vmem:[%s1534_s25 + $0xd58] sm:$0xff] %v567_v43  ;;  %v631_v43 = vld [vmem:[%s1525_s24 + $0xf58] sm:$0xff] }
 0x1d6   : > { %1080 = vst [vmem:[%s1534_s25 + $0xd60] sm:$0xff] %v568_v44  ;;  %v632_v44 = vld [vmem:[%s1525_s24 + $0xf60] sm:$0xff] }
 0x1d7   : > { %1081 = vst [vmem:[%s1534_s25 + $0xd68] sm:$0xff] %v569_v45  ;;  %v633_v45 = vld [vmem:[%s1525_s24 + $0xf68] sm:$0xff] }
 0x1d8   : > { %1082 = vst [vmem:[%s1534_s25 + $0xd70] sm:$0xff] %v570_v46  ;;  %v634_v46 = vld [vmem:[%s1525_s24 + $0xf70] sm:$0xff] }
 0x1d9   : > { %1083 = vst [vmem:[%s1534_s25 + $0xd78] sm:$0xff] %v571_v47  ;;  %v635_v47 = vld [vmem:[%s1525_s24 + $0xf78] sm:$0xff] }
 0x1da   : > { %1084 = vst [vmem:[%s1534_s25 + $0xd80] sm:$0xff] %v572_v48  ;;  %v636_v48 = vld [vmem:[%s1525_s24 + $0xf80] sm:$0xff] }
 0x1db   : > { %1085 = vst [vmem:[%s1534_s25 + $0xd88] sm:$0xff] %v573_v49  ;;  %v637_v49 = vld [vmem:[%s1525_s24 + $0xf88] sm:$0xff] }
 0x1dc   : > { %1086 = vst [vmem:[%s1534_s25 + $0xd90] sm:$0xff] %v574_v50  ;;  %v638_v50 = vld [vmem:[%s1525_s24 + $0xf90] sm:$0xff] }
 0x1dd   : > { %1087 = vst [vmem:[%s1534_s25 + $0xd98] sm:$0xff] %v575_v51  ;;  %v639_v51 = vld [vmem:[%s1525_s24 + $0xf98] sm:$0xff] }
 0x1de   : > { %1088 = vst [vmem:[%s1534_s25 + $0xda0] sm:$0xff] %v576_v52  ;;  %v640_v52 = vld [vmem:[%s1525_s24 + $0xfa0] sm:$0xff] }
 0x1df   : > { %1089 = vst [vmem:[%s1534_s25 + $0xda8] sm:$0xff] %v577_v53  ;;  %v641_v53 = vld [vmem:[%s1525_s24 + $0xfa8] sm:$0xff] }
 0x1e0   : > { %1090 = vst [vmem:[%s1534_s25 + $0xdb0] sm:$0xff] %v578_v54  ;;  %v642_v54 = vld [vmem:[%s1525_s24 + $0xfb0] sm:$0xff] }
 0x1e1   : > { %1091 = vst [vmem:[%s1534_s25 + $0xdb8] sm:$0xff] %v579_v55  ;;  %v643_v55 = vld [vmem:[%s1525_s24 + $0xfb8] sm:$0xff] }
 0x1e2   : > { %1092 = vst [vmem:[%s1534_s25 + $0xdc0] sm:$0xff] %v580_v56  ;;  %v644_v56 = vld [vmem:[%s1525_s24 + $0xfc0] sm:$0xff] }
 0x1e3   : > { %1093 = vst [vmem:[%s1534_s25 + $0xdc8] sm:$0xff] %v581_v57  ;;  %v645_v57 = vld [vmem:[%s1525_s24 + $0xfc8] sm:$0xff] }
 0x1e4   : > { %1094 = vst [vmem:[%s1534_s25 + $0xdd0] sm:$0xff] %v582_v58  ;;  %v646_v58 = vld [vmem:[%s1525_s24 + $0xfd0] sm:$0xff] }
 0x1e5   : > { %1095 = vst [vmem:[%s1534_s25 + $0xdd8] sm:$0xff] %v583_v59  ;;  %v647_v59 = vld [vmem:[%s1525_s24 + $0xfd8] sm:$0xff] }
 0x1e6   : > { %1096 = vst [vmem:[%s1534_s25 + $0xde0] sm:$0xff] %v584_v60  ;;  %v648_v60 = vld [vmem:[%s1525_s24 + $0xfe0] sm:$0xff] }
 0x1e7   : > { %1097 = vst [vmem:[%s1534_s25 + $0xde8] sm:$0xff] %v585_v61  ;;  %v649_v61 = vld [vmem:[%s1525_s24 + $0xfe8] sm:$0xff] }
 0x1e8   : > { %1098 = vst [vmem:[%s1534_s25 + $0xdf0] sm:$0xff] %v586_v62  ;;  %v650_v62 = vld [vmem:[%s1525_s24 + $0xff0] sm:$0xff] }
 0x1e9   : > { %1099 = vst [vmem:[%s1534_s25 + $0xdf8] sm:$0xff] %v587_v63  ;;  %v651_v63 = vld [vmem:[%s1525_s24 + $0xff8] sm:$0xff] }
 0x1ea   : > { %1100 = vst [vmem:[%s1534_s25 + $0xe00] sm:$0xff] %v588_v0 }
 0x1eb   : > { %1101 = vst [vmem:[%s1534_s25 + $0xe08] sm:$0xff] %v589_v1 }
 0x1ec   : > { %1102 = vst [vmem:[%s1534_s25 + $0xe10] sm:$0xff] %v590_v2 }
 0x1ed   : > { %1103 = vst [vmem:[%s1534_s25 + $0xe18] sm:$0xff] %v591_v3 }
 0x1ee   : > { %1104 = vst [vmem:[%s1534_s25 + $0xe20] sm:$0xff] %v592_v4 }
 0x1ef   : > { %1105 = vst [vmem:[%s1534_s25 + $0xe28] sm:$0xff] %v593_v5 }
 0x1f0   : > { %1106 = vst [vmem:[%s1534_s25 + $0xe30] sm:$0xff] %v594_v6 }
 0x1f1   : > { %1107 = vst [vmem:[%s1534_s25 + $0xe38] sm:$0xff] %v595_v7 }
 0x1f2   : > { %1108 = vst [vmem:[%s1534_s25 + $0xe40] sm:$0xff] %v596_v8 }
 0x1f3   : > { %1109 = vst [vmem:[%s1534_s25 + $0xe48] sm:$0xff] %v597_v9 }
 0x1f4   : > { %1110 = vst [vmem:[%s1534_s25 + $0xe50] sm:$0xff] %v598_v10 }
 0x1f5   : > { %1111 = vst [vmem:[%s1534_s25 + $0xe58] sm:$0xff] %v599_v11 }
 0x1f6   : > { %1112 = vst [vmem:[%s1534_s25 + $0xe60] sm:$0xff] %v600_v12 }
 0x1f7   : > { %1113 = vst [vmem:[%s1534_s25 + $0xe68] sm:$0xff] %v601_v13 }
 0x1f8   : > { %1114 = vst [vmem:[%s1534_s25 + $0xe70] sm:$0xff] %v602_v14 }
 0x1f9   : > { %1115 = vst [vmem:[%s1534_s25 + $0xe78] sm:$0xff] %v603_v15 }
 0x1fa   : > { %1116 = vst [vmem:[%s1534_s25 + $0xe80] sm:$0xff] %v604_v16 }
 0x1fb   : > { %1117 = vst [vmem:[%s1534_s25 + $0xe88] sm:$0xff] %v605_v17 }
 0x1fc   : > { %1118 = vst [vmem:[%s1534_s25 + $0xe90] sm:$0xff] %v606_v18 }
 0x1fd   : > { %1119 = vst [vmem:[%s1534_s25 + $0xe98] sm:$0xff] %v607_v19 }
 0x1fe   : > { %1120 = vst [vmem:[%s1534_s25 + $0xea0] sm:$0xff] %v608_v20 }
 0x1ff   : > { %1121 = vst [vmem:[%s1534_s25 + $0xea8] sm:$0xff] %v609_v21 }
 0x200   : > { %1122 = vst [vmem:[%s1534_s25 + $0xeb0] sm:$0xff] %v610_v22 }
 0x201   : > { %1123 = vst [vmem:[%s1534_s25 + $0xeb8] sm:$0xff] %v611_v23 }
 0x202   : > { %1124 = vst [vmem:[%s1534_s25 + $0xec0] sm:$0xff] %v612_v24 }
 0x203   : > { %1125 = vst [vmem:[%s1534_s25 + $0xec8] sm:$0xff] %v613_v25 }
 0x204   : > { %1126 = vst [vmem:[%s1534_s25 + $0xed0] sm:$0xff] %v614_v26 }
 0x205   : > { %1127 = vst [vmem:[%s1534_s25 + $0xed8] sm:$0xff] %v615_v27 }
 0x206   : > { %1128 = vst [vmem:[%s1534_s25 + $0xee0] sm:$0xff] %v616_v28 }
 0x207   : > { %1129 = vst [vmem:[%s1534_s25 + $0xee8] sm:$0xff] %v617_v29 }
 0x208   : > { %1130 = vst [vmem:[%s1534_s25 + $0xef0] sm:$0xff] %v618_v30 }
 0x209   : > { %1131 = vst [vmem:[%s1534_s25 + $0xef8] sm:$0xff] %v619_v31 }
 0x20a   : > { %1132 = vst [vmem:[%s1534_s25 + $0xf00] sm:$0xff] %v620_v32 }
 0x20b   : > { %1133 = vst [vmem:[%s1534_s25 + $0xf08] sm:$0xff] %v621_v33 }
 0x20c   : > { %1134 = vst [vmem:[%s1534_s25 + $0xf10] sm:$0xff] %v622_v34 }
 0x20d   : > { %1135 = vst [vmem:[%s1534_s25 + $0xf18] sm:$0xff] %v623_v35 }
 0x20e   : > { %1136 = vst [vmem:[%s1534_s25 + $0xf20] sm:$0xff] %v624_v36 }
 0x20f   : > { %1137 = vst [vmem:[%s1534_s25 + $0xf28] sm:$0xff] %v625_v37 }
 0x210   : > { %1138 = vst [vmem:[%s1534_s25 + $0xf30] sm:$0xff] %v626_v38 }
 0x211   : > { %1139 = vst [vmem:[%s1534_s25 + $0xf38] sm:$0xff] %v627_v39 }
 0x212   : > { %1140 = vst [vmem:[%s1534_s25 + $0xf40] sm:$0xff] %v628_v40 }
 0x213   : > { %1141 = vst [vmem:[%s1534_s25 + $0xf48] sm:$0xff] %v629_v41 }
 0x214   : > { %1142 = vst [vmem:[%s1534_s25 + $0xf50] sm:$0xff] %v630_v42 }
 0x215   : > { %1143 = vst [vmem:[%s1534_s25 + $0xf58] sm:$0xff] %v631_v43 }
 0x216   : > { %1144 = vst [vmem:[%s1534_s25 + $0xf60] sm:$0xff] %v632_v44 }
 0x217   : > { %1145 = vst [vmem:[%s1534_s25 + $0xf68] sm:$0xff] %v633_v45 }
 0x218   : > { %1146 = vst [vmem:[%s1534_s25 + $0xf70] sm:$0xff] %v634_v46 }
 0x219   : > { %1147 = vst [vmem:[%s1534_s25 + $0xf78] sm:$0xff] %v635_v47 }
 0x21a   : > { %1148 = vst [vmem:[%s1534_s25 + $0xf80] sm:$0xff] %v636_v48 }
 0x21b   : > { %1149 = vst [vmem:[%s1534_s25 + $0xf88] sm:$0xff] %v637_v49 }
 0x21c   : > { %1150 = vst [vmem:[%s1534_s25 + $0xf90] sm:$0xff] %v638_v50 }
 0x21d   : > { %1151 = vst [vmem:[%s1534_s25 + $0xf98] sm:$0xff] %v639_v51 }
 0x21e   : > { %1152 = vst [vmem:[%s1534_s25 + $0xfa0] sm:$0xff] %v640_v52 }
 0x21f   : > { %1153 = vst [vmem:[%s1534_s25 + $0xfa8] sm:$0xff] %v641_v53 }
 0x220   : > { %1154 = vst [vmem:[%s1534_s25 + $0xfb0] sm:$0xff] %v642_v54 }
 0x221   : > { %1155 = vst [vmem:[%s1534_s25 + $0xfb8] sm:$0xff] %v643_v55 }
 0x222   : > { %1156 = vst [vmem:[%s1534_s25 + $0xfc0] sm:$0xff] %v644_v56 }
 0x223   : > { %1157 = vst [vmem:[%s1534_s25 + $0xfc8] sm:$0xff] %v645_v57 }
 0x224   : > { %1158 = vst [vmem:[%s1534_s25 + $0xfd0] sm:$0xff] %v646_v58 }
 0x225   : > { %1159 = vst [vmem:[%s1534_s25 + $0xfd8] sm:$0xff] %v647_v59 }
 0x226   : > { %1160 = vst [vmem:[%s1534_s25 + $0xfe0] sm:$0xff] %v648_v60 }
 0x227   : > { %1161 = vst [vmem:[%s1534_s25 + $0xfe8] sm:$0xff] %v649_v61 }
 0x228   : > { %1162 = vst [vmem:[%s1534_s25 + $0xff0] sm:$0xff] %v650_v62 }
 0x229   : > { %1163 = vst [vmem:[%s1534_s25 + $0xff8] sm:$0xff] %v651_v63 }
 0x22a   : > { %1381 = shalt.err (!%p1378_p4)
}
 0x22b   : > { %s1424_s16 = smov 512   ;;  %s1425_s20 = smov 32  }
 0x22c   : > { %1276 = dma.vmem_to_hbm [thread:$0]  (%p1485_p10), %s1179_s10, 65536, %s1181_s29, %s1165_s30, %s1424_s16, %s1424_s16, %s1425_s20  }
 0x22d PF: > { %p1287_p5 = scmp.ge.s32.totalorder %s1420_s9, 2  ;;  %s1195_s21 = sand.u32 1, %s1408_s6  }
 0x22e   : > { %s1196_s22 = scalar_lea.sflag [#allocation4], %s1195_s21 }
 0x22f   : > { %p1283_p7 = pnand %p1287_p5, %p1489_p11 }
 0x231   : > { %p1284_p8 = pneg %p1283_p7 }
 0x233   : > { %1403 = dma.done.wait (%p1284_p8), %s1196_s22, 65536  }
 0x234   : > { %1405 = vsyncadd (%p1284_p8), %s1196_s22, 4294901760  ;;  %p14_p9 = scmp.ge.s32.totalorder %s1461_s12, 5   ;;  %s2597_s6 = smov %s1412_s7 }
 0x235   : > { %s2598_s7 = smov %s1416_s8  ;;  %s2599_s8 = smov %s1473_s15 }
 0x236   : > { %s2600_s9 = smov %s1461_s12  ;;  %16 = sbr.rel (!%p14_p9) target bundleno = 5 (0x5), region = 69 }
 0x23b   :  { %1202 = vsyncpa [#allocation3], 1 }
 0x23c   :  { %1204 = vsyncpa [#allocation3 + $0x1], 1 }
 0x23d   :  { %1205 = vsyncpa [#allocation4], 1 }
 0x23e   :  { %1207 = vsyncpa [#allocation4 + $0x1], 1 }

</bundles_post_ra>
